<compile_context>
chip_gen: v7x
topology: tpu7x:2x2x1
jax: 0.10.0
libtpu: 0.0.40
codegen_flags: <defaults>
</compile_context>

<pallas_src>
import functools
import numpy as np
import jax
import jax.numpy as jnp
from jax.experimental import pallas as pl
from jax.experimental.pallas import tpu as pltpu

N_PRIME = 512


def _tanh_dtype_default():
    """bf16 tanh on chips with bf16 VPU/EUP (v6e / v7x); f32 elsewhere (v5e/v4/...)."""
    try:
        kind = jax.devices()[0].device_kind.lower()
    except Exception:
        return jnp.float32
    if ("v6" in kind) or ("v7" in kind) or ("tpu7" in kind):
        return jnp.bfloat16
    return jnp.float32


# ---------------------------------------------------------------------------
# Fused kernel: (conv-folded) attention MLP + softmax + context, per batch row
# ---------------------------------------------------------------------------
def _attn_kernel(act_ref, w_ref, bias_ref, nu_ref, alpha_ref, ctx_ref, *,
                 C, tanh_dtype, np_chunk):
    # act_ref  : (1, CCAp, L)  bf16  [annotations ; im2col(coverage sum) ; 0-pad rows]
    # w_ref    : (CCAp, Np)    bf16  [U_a^T ; (U_f@Wc)^T ; 0]  batch-invariant, resident
    # bias_ref : (1, 1, Np)    f32   u_pred + U_f@conv_b       per batch row
    # nu_ref   : (1, Np)       f32   shared, resident
    # alpha_ref: (1, 1, L)     f32 out  attention weights
    # ctx_ref  : (1, 1, C)     f32 out  context vector (lane-dense on C)
    act = act_ref[0]                                  # (CCAp, L) bf16, loaded once
    L = act.shape[-1]
    Np = w_ref.shape[-1]
    nc = np_chunk
    n_chunks = Np // nc

    # e[l] = sum_n nu[n] * tanh( sum_ca w[ca, n]*act[ca, l] + bias[n] ),
    # chunked over Np so the live (L, nc) intermediate stays small and EUP tanh
    # interleaves with the MXU nu-accumulate.
    def chunk(ci, e_acc):
        off = pl.multiple_of(ci * nc, nc)
        w_c = w_ref[:, pl.ds(off, nc)]                # (CCAp, nc) bf16
        # One MXU contraction = conv + U_a@a + U_f@conv   (transposed-LHS form)
        pre = jax.lax.dot_general(
            act, w_c, (((0,), (0,)), ((), ())),
            preferred_element_type=jnp.float32)       # (L, nc) f32 accumulation
        pre = pre + bias_ref[0, :, pl.ds(off, nc)]    # + (u_pred + U_f@b), f32 exact
        t = jnp.tanh(pre.astype(tanh_dtype))          # EUP-bound (bf16 on v6e/v7x)
        nu_c = nu_ref[:, pl.ds(off, nc)].astype(tanh_dtype)   # (1, nc)
        e_c = jax.lax.dot_general(
            nu_c, t, (((1,), (1,)), ((), ())),
            preferred_element_type=jnp.float32)       # (1, L) f32
        return e_acc + e_c

    e = jax.lax.fori_loop(0, n_chunks, chunk,
                          jnp.zeros((1, L), jnp.float32), unroll=True)

    # Numerically-stable softmax over L, kept in f32; divide -> EUP reciprocal.
    m = jnp.max(e, axis=-1, keepdims=True)
    p = jnp.exp(e - m)                                # (1, L) unnormalized
    inv = pl.reciprocal(jnp.sum(p, axis=-1, keepdims=True), approx=True)
    alpha_ref[0] = p * inv                            # (1, L) lane-dense store

    # context_c = sum_l alpha[l] * a[c, l]  -> MXU dot contracting L, f32 accum.
    # (annotation rows are upcast in vregs so the reduction runs fully in f32)
    a_f32 = act[:C, :].astype(jnp.float32)            # (C, L)
    ctx = jax.lax.dot_general(
        p, a_f32, (((1,), (1,)), ((), ())),
        preferred_element_type=jnp.float32)           # (1, C) lane-dense
    ctx_ref[0] = ctx * inv


# ---------------------------------------------------------------------------
# Wrapper (forward pass; alpha coverage history is passed explicitly as state)
# ---------------------------------------------------------------------------
def coverage_attention_forward(x, u_pred, alpha, params, *, kernel_size, padding,
                               tanh_dtype=None, np_chunk=256):
    """Matches CoverageAttention.forward.

    x      : (B, C, H, W) float32
    u_pred : (B, n_prime) float32
    alpha  : (B, T, L)    float32 coverage history (zeros row for the first call)
    returns: (context (B, C), new_alpha (B, T+1, L))
    """
    B, C, H, W = x.shape
    L = H * W
    K = kernel_size
    pad = padding
    Q = params["conv_w"].shape[0]
    Np = params["U_a"].shape[0]
    # the reference module only type-checks when the conv preserves H*W
    assert 2 * pad == K - 1, "padding must be (kernel_size - 1) // 2 so H*W is preserved"
    assert L % 128 == 0, "attn_size (H*W) must be a multiple of 128 for lane-dense tiles"
    # TODO(synk): pad/mask the L axis for arbitrary H*W.
    if tanh_dtype is None:
        tanh_dtype = _tanh_dtype_default()
    np_chunk = min(np_chunk, Np)
    assert Np % np_chunk == 0 and np_chunk % 128 == 0

    f32, bf16 = jnp.float32, jnp.bfloat16

    # --- coverage-state glue (plain JAX): sum history, zero-pad, im2col ------
    # TODO(synk): a decode loop should carry a running coverage sum and a
    # fixed-size alpha buffer; re-summing the growing (B, T, L) history is O(T^2)
    # and the T-dependent shapes force a retrace every decode step.
    alpha_sum = alpha.sum(axis=1).reshape(B, H, W).astype(f32)
    ap = jnp.pad(alpha_sum, ((0, 0), (pad, pad), (pad, pad)))
    # im2col patches: ap_cols[b, ki*K+kj, i*W+j] = padded_alpha_sum[b, i+ki, j+kj]
    cols = [ap[:, ki:ki + H, kj:kj + W].reshape(B, 1, L)
            for ki in range(K) for kj in range(K)]
    ap_cols = jnp.concatenate(cols, axis=1)                       # (B, K*K, L)

    CCA = C + K * K
    CCAp = ((CCA + 7) // 8) * 8        # zero-pad folded contraction dim to sublane tile
    act_aug = jnp.concatenate(
        [x.reshape(B, C, L), ap_cols,
         jnp.zeros((B, CCAp - CCA, L), f32)], axis=1).astype(bf16)  # (B, CCAp, L) bf16

    # --- fold the conv into the attention weights (exact; conv is linear) ----
    Wc = params["conv_w"].reshape(Q, K * K).astype(f32)           # (Q, K*K)
    U_a = params["U_a"].astype(f32)                               # (Np, C)
    U_f = params["U_f"].astype(f32)                               # (Np, Q)
    w_shared = jnp.concatenate(
        [U_a.T, (U_f @ Wc).T, jnp.zeros((CCAp - CCA, Np), f32)],
        axis=0).astype(bf16)                                      # (CCAp, Np) batch-invariant
    bias = (u_pred.astype(f32) + (U_f @ params["conv_b"].astype(f32))[None, :]
            ).reshape(B, 1, Np)                                   # (B, 1, Np) f32, per batch
    nu = params["nu_attn"].reshape(1, Np).astype(f32)             # (1, Np)

    alpha_t, ctx = pl.pallas_call(
        functools.partial(_attn_kernel, C=C, tanh_dtype=tanh_dtype, np_chunk=np_chunk),
        out_shape=(jax.ShapeDtypeStruct((B, 1, L), f32),
                   jax.ShapeDtypeStruct((B, 1, C), f32)),
        grid=(B,),
        in_specs=[
            pl.BlockSpec((1, CCAp, L), lambda b: (b, 0, 0)),      # activations, per batch
            pl.BlockSpec((CCAp, Np), lambda b: (0, 0)),           # shared weight, resident
            pl.BlockSpec((1, 1, Np), lambda b: (b, 0, 0)),        # per-batch bias row
            pl.BlockSpec((1, Np), lambda b: (0, 0)),              # nu, resident
        ],
        out_specs=(pl.BlockSpec((1, 1, L), lambda b: (b, 0, 0)),  # attention weights
                   pl.BlockSpec((1, 1, C), lambda b: (b, 0, 0))), # context (lane-dense C)
        compiler_params=pltpu.CompilerParams(
            dimension_semantics=("parallel",)),    # batch shards over TCs on v7x
    )(act_aug, w_shared, bias, nu)

    # TODO(synk): for large L add an L grid axis with an online softmax ("arbitrary",
    # L tiles multiple of 128) and re-derive the VMEM budget on v7x (64 MiB physical).
    # TODO(synk): for small B on v6e/v7x, block several batch rows per grid step
    # (batched dot_general in-kernel) to amortize the ~0.35us per-step overhead.

    # stateful "self.alpha = cat(alpha, alpha_t)" kept as plain-JAX glue
    new_alpha = jnp.concatenate([alpha, alpha_t], axis=1)
    return ctx[:, 0, :], new_alpha


# ---------------------------------------------------------------------------
# Pure-JAX reference (for correctness check)
# ---------------------------------------------------------------------------
def reference_forward(x, u_pred, alpha, params, kernel_size, padding):
    B, C, H, W = x.shape
    L = H * W
    Q = params["conv_w"].shape[0]
    alpha_sum = alpha.sum(1).reshape(B, 1, H, W)
    conv = jax.lax.conv_general_dilated(
        alpha_sum, params["conv_w"], window_strides=(1, 1),
        padding=[(padding, padding), (padding, padding)],
        dimension_numbers=("NCHW", "OIHW", "NCHW"))
    conv = conv + params["conv_b"][None, :, None, None]
    conv = conv.reshape(B, Q, L)
    a = x.reshape(B, C, L)
    u_a = jnp.einsum("nc,bcl->bnl", params["U_a"], a)
    u_f = jnp.einsum("nq,bql->bnl", params["U_f"], conv)
    t = jnp.tanh(u_pred[:, :, None] + u_a + u_f)
    e = jnp.einsum("n,bnl->bl", params["nu_attn"], t)
    alpha_t = jax.nn.softmax(e, axis=1)
    ctx = jnp.sum(alpha_t[:, None, :] * a, axis=2)
    return ctx, jnp.concatenate([alpha, alpha_t[:, None, :]], axis=1)


if __name__ == "__main__":
    # small shapes consistent with the module
    B, C, H, W = 2, 4, 16, 16        # input_size = C
    Q = 4                            # output_size (coverage channels)
    K, P = 3, 1                      # kernel_size, padding = (K-1)//2
    L = H * W                        # attn_size

    key = jax.random.PRNGKey(0)
    ks = jax.random.split(key, 6)
    params = {
        # xavier-normal-style deterministic init
        "U_a": jax.random.normal(ks[0], (N_PRIME, C), jnp.float32) * np.sqrt(2.0 / (N_PRIME + C)),
        "U_f": jax.random.normal(ks[1], (N_PRIME, Q), jnp.float32) * np.sqrt(2.0 / (N_PRIME + Q)),
        "nu_attn": jax.random.normal(ks[2], (N_PRIME,), jnp.float32) * np.sqrt(2.0 / (N_PRIME + 1)),
        "conv_w": jax.random.normal(ks[3], (Q, 1, K, K), jnp.float32) * 0.1,
        "conv_b": jax.random.normal(ks[4], (Q,), jnp.float32) * 0.1,
    }
    x = jax.random.normal(ks[5], (B, C, H, W), jnp.float32)
    u_pred = jax.random.normal(jax.random.PRNGKey(1), (B, N_PRIME), jnp.float32)

    # first call: reset_alpha -> zeros coverage state
    alpha0 = jnp.zeros((B, 1, L), jnp.float32)

    ctx1, alpha1 = coverage_attention_forward(x, u_pred, alpha0, params,
                                              kernel_size=K, padding=P)
    # second call exercises the coverage path on a non-zero alpha history
    ctx2, alpha2 = coverage_attention_forward(x, u_pred, alpha1, params,
                                              kernel_size=K, padding=P)
    jax.block_until_ready((ctx1, ctx2, alpha2))

    ref1, ralpha1 = reference_forward(x, u_pred, alpha0, params, K, P)
    ref2, _ = reference_forward(x, u_pred, ralpha1, params, K, P)

    # bf16 MXU operands (all generations) + possibly bf16 tanh (v6e/v7x)
    np.testing.assert_allclose(np.asarray(alpha1[:, -1, :]),
                               np.asarray(ralpha1[:, -1, :]), atol=2e-3)
    np.testing.assert_allclose(np.asarray(ctx1), np.asarray(ref1), rtol=2e-2, atol=2e-2)
    np.testing.assert_allclose(np.asarray(ctx2), np.asarray(ref2), rtol=2e-2, atol=2e-2)

    print("KERNEL_OK")
</pallas_src>

<mosaic_0001>
module attributes {stable_mosaic.version = 11 : i64} {
  func.func @_attn_kernel(%arg0: i32, %arg1: memref<1x16x256xbf16, #tpu.memory_space<vmem>>, %arg2: memref<16x512xbf16, #tpu.memory_space<vmem>>, %arg3: memref<1x1x512xf32, #tpu.memory_space<vmem>>, %arg4: memref<1x512xf32, #tpu.memory_space<vmem>>, %arg5: memref<1x1x256xf32, #tpu.memory_space<vmem>>, %arg6: memref<1x1x4xf32, #tpu.memory_space<vmem>>) attributes {dimension_semantics = [#tpu.dimension_semantics<parallel>], iteration_bounds = array<i64: 2>, scalar_prefetch = 0 : i64, scratch_operands = 0 : i64, tpu.core_type = #tpu.core_type<tc>, window_params = [{transform_indices = @transform_0, window_bounds = array<i64: 1, 16, 256>}, {pipeline_mode = #tpu.pipeline_mode<synchronous>, transform_indices = @transform_1, window_bounds = array<i64: 16, 512>}, {transform_indices = @transform_2, window_bounds = array<i64: 1, 1, 512>}, {pipeline_mode = #tpu.pipeline_mode<synchronous>, transform_indices = @transform_3, window_bounds = array<i64: 1, 512>}, {transform_indices = @transform_4, window_bounds = array<i64: 1, 1, 256>}, {transform_indices = @transform_5, window_bounds = array<i64: 1, 1, 4>}]} {
    %c0 = arith.constant 0 : index
    %c0_0 = arith.constant 0 : index
    %c0_1 = arith.constant 0 : index
    %0 = vector.load %arg1[%c0, %c0_0, %c0_1] : memref<1x16x256xbf16, #tpu.memory_space<vmem>>, vector<1x16x256xbf16>
    %1 = vector.shape_cast %0 : vector<1x16x256xbf16> to vector<16x256xbf16>
    %cst = arith.constant 0.000000e+00 : f32
    %2 = vector.broadcast %cst : f32 to vector<1x256xf32>
    %c0_i32 = arith.constant 0 : i32
    %c256_i32 = arith.constant 256 : i32
    %3 = arith.muli %c0_i32, %c256_i32 : i32
    %4 = tpu.assume_multiple %3, 256 : i32
    %c0_2 = arith.constant 0 : index
    %5 = arith.index_cast %4 : i32 to index
    %6 = vector.load %arg2[%c0_2, %5] : memref<16x512xbf16, #tpu.memory_space<vmem>>, vector<16x256xbf16>
    %cst_3 = arith.constant dense<0.000000e+00> : vector<256x256xf32>
    %7 = tpu.matmul %1, %6, %cst_3 {dimension_numbers = #tpu.dot_dimension_numbers<[0], [0], [1], [1], [0, 1, 1, 1], [], []>} : vector<16x256xbf16>, vector<16x256xbf16>, vector<256x256xf32> -> vector<256x256xf32>
    %c0_4 = arith.constant 0 : index
    %c0_5 = arith.constant 0 : index
    %8 = arith.index_cast %4 : i32 to index
    %9 = vector.load %arg3[%c0_4, %c0_5, %8] : memref<1x1x512xf32, #tpu.memory_space<vmem>>, vector<1x1x256xf32>
    %10 = vector.shape_cast %9 : vector<1x1x256xf32> to vector<1x256xf32>
    %11 = vector.broadcast %10 : vector<1x256xf32> to vector<256x256xf32>
    %12 = arith.addf %7, %11 : vector<256x256xf32>
    %13 = math.tanh %12 : vector<256x256xf32>
    %c0_6 = arith.constant 0 : index
    %14 = arith.index_cast %4 : i32 to index
    %15 = vector.load %arg4[%c0_6, %14] : memref<1x512xf32, #tpu.memory_space<vmem>>, vector<1x256xf32>
    %cst_7 = arith.constant dense<0.000000e+00> : vector<1x256xf32>
    %16 = tpu.matmul %15, %13, %cst_7 {dimension_numbers = #tpu.dot_dimension_numbers<[1], [1], [0], [0], [0, 0, 1, 0], [], []>} : vector<1x256xf32>, vector<256x256xf32>, vector<1x256xf32> -> vector<1x256xf32>
    %17 = arith.addf %2, %16 : vector<1x256xf32>
    %c1_i32 = arith.constant 1 : i32
    %c256_i32_8 = arith.constant 256 : i32
    %18 = arith.muli %c1_i32, %c256_i32_8 : i32
    %19 = tpu.assume_multiple %18, 256 : i32
    %c0_9 = arith.constant 0 : index
    %20 = arith.index_cast %19 : i32 to index
    %21 = vector.load %arg2[%c0_9, %20] : memref<16x512xbf16, #tpu.memory_space<vmem>>, vector<16x256xbf16>
    %cst_10 = arith.constant dense<0.000000e+00> : vector<256x256xf32>
    %22 = tpu.matmul %1, %21, %cst_10 {dimension_numbers = #tpu.dot_dimension_numbers<[0], [0], [1], [1], [0, 1, 1, 1], [], []>} : vector<16x256xbf16>, vector<16x256xbf16>, vector<256x256xf32> -> vector<256x256xf32>
    %c0_11 = arith.constant 0 : index
    %c0_12 = arith.constant 0 : index
    %23 = arith.index_cast %19 : i32 to index
    %24 = vector.load %arg3[%c0_11, %c0_12, %23] : memref<1x1x512xf32, #tpu.memory_space<vmem>>, vector<1x1x256xf32>
    %25 = vector.shape_cast %24 : vector<1x1x256xf32> to vector<1x256xf32>
    %26 = vector.broadcast %25 : vector<1x256xf32> to vector<256x256xf32>
    %27 = arith.addf %22, %26 : vector<256x256xf32>
    %28 = math.tanh %27 : vector<256x256xf32>
    %c0_13 = arith.constant 0 : index
    %29 = arith.index_cast %19 : i32 to index
    %30 = vector.load %arg4[%c0_13, %29] : memref<1x512xf32, #tpu.memory_space<vmem>>, vector<1x256xf32>
    %cst_14 = arith.constant dense<0.000000e+00> : vector<1x256xf32>
    %31 = tpu.matmul %30, %28, %cst_14 {dimension_numbers = #tpu.dot_dimension_numbers<[1], [1], [0], [0], [0, 0, 1, 0], [], []>} : vector<1x256xf32>, vector<256x256xf32>, vector<1x256xf32> -> vector<1x256xf32>
    %32 = arith.addf %17, %31 : vector<1x256xf32>
    %c2_i32 = arith.constant 2 : i32
    %cst_15 = arith.constant dense<0xFF800000> : vector<1xf32>
    %33 = vector.multi_reduction <maximumf>, %32, %cst_15 [1] : vector<1x256xf32> to vector<1xf32>
    %34 = vector.shape_cast %33 : vector<1xf32> to vector<1x1xf32>
    %35 = vector.broadcast %34 : vector<1x1xf32> to vector<1x256xf32>
    %36 = arith.subf %32, %35 : vector<1x256xf32>
    %37 = math.exp %36 : vector<1x256xf32>
    %cst_16 = arith.constant dense<0.000000e+00> : vector<1xf32>
    %38 = vector.multi_reduction <add>, %37, %cst_16 [1] : vector<1x256xf32> to vector<1xf32>
    %39 = vector.shape_cast %38 : vector<1xf32> to vector<1x1xf32>
    %40 = tpu.reciprocal %39 {approx = true} : vector<1x1xf32> -> vector<1x1xf32>
    %41 = vector.broadcast %40 : vector<1x1xf32> to vector<1x256xf32>
    %42 = arith.mulf %37, %41 : vector<1x256xf32>
    %c0_17 = arith.constant 0 : index
    %c0_18 = arith.constant 0 : index
    %c0_19 = arith.constant 0 : index
    %43 = vector.load %arg5[%c0_17, %c0_18, %c0_19] : memref<1x1x256xf32, #tpu.memory_space<vmem>>, vector<1x1x256xf32>
    %44 = vector.shape_cast %43 : vector<1x1x256xf32> to vector<1x256xf32>
    %45 = vector.shape_cast %42 : vector<1x256xf32> to vector<1x1x256xf32>
    tpu.vector_store %arg5[%c0_17, %c0_18, %c0_19], %45 {strides = array<i32>} : memref<1x1x256xf32, #tpu.memory_space<vmem>>, vector<1x1x256xf32>,
    %46 = vector.extract_strided_slice %1 {offsets = [0, 0], sizes = [4, 256], strides = [1, 1]} : vector<16x256xbf16> to vector<4x256xbf16>
    %47 = arith.extf %46 : vector<4x256xbf16> to vector<4x256xf32>
    %cst_20 = arith.constant dense<0.000000e+00> : vector<1x4xf32>
    %48 = tpu.matmul %37, %47, %cst_20 {dimension_numbers = #tpu.dot_dimension_numbers<[1], [1], [0], [0], [0, 0, 1, 0], [], []>} : vector<1x256xf32>, vector<4x256xf32>, vector<1x4xf32> -> vector<1x4xf32>
    %49 = vector.broadcast %40 : vector<1x1xf32> to vector<1x4xf32>
    %50 = arith.mulf %48, %49 : vector<1x4xf32>
    %c0_21 = arith.constant 0 : index
    %c0_22 = arith.constant 0 : index
    %c0_23 = arith.constant 0 : index
    %51 = vector.load %arg6[%c0_21, %c0_22, %c0_23] : memref<1x1x4xf32, #tpu.memory_space<vmem>>, vector<1x1x4xf32>
    %52 = vector.shape_cast %51 : vector<1x1x4xf32> to vector<1x4xf32>
    %53 = vector.shape_cast %50 : vector<1x4xf32> to vector<1x1x4xf32>
    tpu.vector_store %arg6[%c0_21, %c0_22, %c0_23], %53 {strides = array<i32>} : memref<1x1x4xf32, #tpu.memory_space<vmem>>, vector<1x1x4xf32>,
    return
  }
  func.func @transform_0(%arg0: i32) -> (i32, i32, i32) {
    %c0_i32 = arith.constant 0 : i32
    %c0_i32_0 = arith.constant 0 : i32
    %c0_i32_1 = arith.constant 0 : i32
    return %arg0, %c0_i32, %c0_i32_0 : i32, i32, i32
  }
  func.func @transform_1(%arg0: i32) -> (i32, i32) {
    %c0_i32 = arith.constant 0 : i32
    %c0_i32_0 = arith.constant 0 : i32
    %c0_i32_1 = arith.constant 0 : i32
    return %c0_i32, %c0_i32_0 : i32, i32
  }
  func.func @transform_2(%arg0: i32) -> (i32, i32, i32) {
    %c0_i32 = arith.constant 0 : i32
    %c0_i32_0 = arith.constant 0 : i32
    %c0_i32_1 = arith.constant 0 : i32
    return %arg0, %c0_i32, %c0_i32_0 : i32, i32, i32
  }
  func.func @transform_3(%arg0: i32) -> (i32, i32) {
    %c0_i32 = arith.constant 0 : i32
    %c0_i32_0 = arith.constant 0 : i32
    %c0_i32_1 = arith.constant 0 : i32
    return %c0_i32, %c0_i32_0 : i32, i32
  }
  func.func @transform_4(%arg0: i32) -> (i32, i32, i32) {
    %c0_i32 = arith.constant 0 : i32
    %c0_i32_0 = arith.constant 0 : i32
    %c0_i32_1 = arith.constant 0 : i32
    return %arg0, %c0_i32, %c0_i32_0 : i32, i32, i32
  }
  func.func @transform_5(%arg0: i32) -> (i32, i32, i32) {
    %c0_i32 = arith.constant 0 : i32
    %c0_i32_0 = arith.constant 0 : i32
    %c0_i32_1 = arith.constant 0 : i32
    return %arg0, %c0_i32, %c0_i32_0 : i32, i32, i32
  }
}

</mosaic_0001>

<bundles_post_ra>
// kernel: tpu_custom_call.1
= control target key start
LH: loop header
LB: loop body
LE: loop exit
PB: predicated region body
PF: predicated region fallthrough
CT: control target
= control target key end

     0   :  { %s2704_s0 = inlined_call_operand.hbm [shape: bf16[2,16,256], index: 0, kind: input, shape index: {}]   ;;  %s2705_s1 = inlined_call_operand.hbm [shape: bf16[16,512], index: 1, kind: input, shape index: {}]   ;;  %s2706_s2 = inlined_call_operand.hbm [shape: f32[2,1,512], index: 2, kind: input, shape index: {}]   ;;  %s2707_s3 = inlined_call_operand.vmem [shape: f32[1,512], index: 3, kind: input, shape index: {}]   ;;  %s2708_s4 = inlined_call_operand.hbm [shape: f32[2,1,256], index: 4, kind: output, shape index: {0}]   ;;  %s2709_s5 = inlined_call_operand.hbm [shape: f32[2,1,4], index: 5, kind: output, shape index: {1}]  }
   0x1   :  { %2717 = sst [smem:[#allocation17_spill]] %s2704_s0 }
   0x2   :  { %11 = vsyncpa [#allocation3], 0 }
   0x3   :  { %13 = vsyncpa [#allocation3 + $0x1], 0 }
   0x4   :  { %14 = vsyncpa [#allocation6], 0 }
   0x5   :  { %15 = vsyncpa [#allocation4], 0 }
   0x6   :  { %17 = vsyncpa [#allocation4 + $0x1], 0 }
   0x7   :  { %18 = vsyncpa [#allocation10], 0 }
   0x8   :  { %20 = vsyncpa [#allocation10 + $0x1], 0  ;;  %s2183_s18 = smov 0   ;;  %s2185_s19 = smov 0  }
   0x9   :  { %s2187_s20 = smov 0   ;;  %s2189_s21 = smov 0  }
   0xa LB: > { %s2204_s22 = sadd.s32 1, %s2140_s21   ;;  %s33_s23 = sadd.s32 1, %s2136_s20  ;;  %s2140_s21 = sphi %s2189_s21, %s2740_s21   ;;  %s2136_s20 = sphi %s2187_s20, %s2739_s20   ;;  %s2132_s19 = sphi %s2185_s19, %s2738_s19   ;;  %s2128_s18 = sphi %s2183_s18, %s2737_s18  }
   0xb   : > { %s30_s24 = ssub.s32 %s2140_s21, %s2204_s22  ;;  %p40_p0 = scmp.ne.s32.totalorder %s2136_s20, %s2132_s19 }
   0xc   : > { %p31_p1 = scmp.eq.s32.totalorder %s30_s24, 0  ;;  %p41_p2 = scmp.eq.s32.totalorder %s2140_s21, 0 }
   0xd   : > { %p1631_p4 = scmp.lt.s32.totalorder %s2140_s21, 2  ;;  %s206_s26 = sand.u32 1, %s2140_s21  }
   0xe   : > { %s2215_s25 = scalar_select %p31_p1, %s2136_s20, %s33_s23  }
   0xf   : > { %p42_p5 = por %p41_p2, %p40_p0  ;;  %s208_s27 = sand.u32 1, %s2136_s20  }
  0x10   : > { %2718 = sst [smem:[#allocation16_spill]] %s2215_s25  ;;  %s1410_s28 = sshll.u32 %s208_s27, 4 }
  0x11   : > { %s1467_s29 = sshll.u32 %s2140_s21, 8  ;;  %s2719_s0 = sld [smem:[#allocation17_spill]] }
  0x12   : > { %s210_s8 = scalar_lea.vmem [#allocation2], %s1410_s28  ;;  %p2230_p6 = pnand %p1631_p4, %p42_p5 }
  0x13   : > { %s217_s9 = sshll.u32 %s210_s8, 4  ;;  %s2236_s11 = scalar_lea.sflag [#allocation3], %s206_s26  ;;  %s2234_s9 = int_to_ptr.vmem [resolvable:$true] %s217_s9 }
  0x14   : > { %s2720_s10 = scalar_select %p2230_p6, 1, 0 }
  0x15   : > { %p2711_p8 = pneg %p2230_p6 }
  0x17   : > { %s2228_s7 = scalar_lea.hbm %s2719_s0, %s1467_s29  ;;  %s1951_s15 = scalar_lea.hbm %s2719_s0, 512 }
  0x18   : > { %s1946_s12 = scalar_lea.hbm %s2228_s7, 256  ;;  %p1952_p11 = scmp.lt.u32.totalorder %s2228_s7, %s2719_s0 }
  0x19   : > { %p1947_p7 = scmp.ne.s32.totalorder %s2228_s7, %s1946_s12  ;;  %p1953_p12 = scmp.lt.u32.totalorder %s1951_s15, %s1946_s12 }
  0x1a   : > { %p1955_p1 = scmp.lt.u32.totalorder %s1946_s12, %s2228_s7 }
  0x1b   : > { %p1949_p9 = pnand %p2711_p8, %p1947_p7  ;;  %p1954_p13 = por %p1953_p12, %p1952_p11 }
  0x1d   : > { %p1950_p10 = pneg %p1949_p9  ;;  %p1956_p2 = por %p1955_p1, %p1954_p13 }
  0x1f   : > { %p1957_p4 = pnand %p1956_p2, %p1950_p10 }
  0x21   : > { %1960 = shalt.err (!%p1957_p4)
}
  0x22   : > { %s1961_s23 = scalar_lea.vmem %s2234_s9, 256  ;;  %s2142_s24 = smov [#allocation2]  }
  0x23   : > { %p1962_p5 = scmp.ne.s32.totalorder %s2234_s9, %s1961_s23  ;;  %s1966_s26 = sshll.u32 %s2142_s24, 4  ;;  %s1967_s26 = int_to_ptr.vmem [resolvable:$false] %s1966_s26 }
  0x24   : > { %s1968_s28 = scalar_lea.vmem %s1967_s26, 512  ;;  %p1969_p3 = scmp.lt.s32.totalorder %s2234_s9, %s1967_s26 }
  0x25   : > { %p1964_p7 = pnand %p1962_p5, %p2711_p8  ;;  %p1970_p11 = scmp.lt.s32.totalorder %s1968_s28, %s1961_s23 }
  0x27   : > { %p1965_p9 = pneg %p1964_p7  ;;  %p1971_p12 = por %p1970_p11, %p1969_p3 }
  0x29   : > { %p1972_p13 = pnand %p1971_p12, %p1965_p9 }
  0x2b   : > { %1975 = shalt.err (!%p1972_p13)
}
  0x2c   : > { %s2143_s29 = smov 128   ;;  %s2144_s30 = smov 8  }
  0x2d   : > { %1619 = dma.hbm_to_vmem [thread:$0]  (!%p2230_p6), %s2228_s7, 256, %s2234_s9, %s2236_s11, %s2143_s29, %s2143_s29, %s2144_s30  }
  0x2e   : > { %s2265_s6 = sadd.s32 4294967295, %s2140_s21   ;;  %s1406_s8 = sadd.s32 4294967294, %s2140_s21  }
  0x2f   : > { %p46_p3 = scmp.ne.s32.totalorder %s2132_s19, %s2128_s18  ;;  %p2710_p10 = scmp.eq.s32.totalorder %s2265_s6, 0 }
  0x30   : > { %p138_p1 = scmp.eq.s32.totalorder %s2265_s6, 1  ;;  %p144_p2 = scmp.eq.s32.totalorder %s1406_s8, 1 }
  0x31   : > { %p2274_p4 = por %p2710_p10, %p46_p3  ;;  %p1407_p5 = scmp.ge.s32.totalorder %s2140_s21, 1 }
  0x32   : > { %p2282_p7 = por %p138_p1, %p40_p0  ;;  %p2286_p9 = por %p144_p2, %p46_p3 }
  0x33   : > { %s2721_s12 = scalar_select %p2274_p4, 1, 0 }
  0x34   : > { %s2722_s7 = scalar_select %p2282_p7, 1, 0 }
  0x35   : > { %s2723_s9 = scalar_select %p2286_p9, 1, 0 }
  0x36   : > { %p177_p11 = scmp.lt.s32.totalorder %s2140_s21, 3  ;;  %s2145_s14 = smov [#allocation5]  }
  0x37   : > { %s189_s15 = sshll.u32 %s2145_s14, 4  ;;  %s1413_s16 = sshll.u32 %s208_s27, 2  ;;  %s2295_s15 = int_to_ptr.vmem [resolvable:$true] %s189_s15 }
  0x38   : > { %p2291_p12 = pnand %p1407_p5, %p177_p11  ;;  %s1468_s17 = sshll.u32 %s2140_s21, 6 }
  0x39   : > { %s2311_s28 = scalar_lea.hbm %s2706_s2, %s1468_s17  ;;  %s231_s29 = scalar_lea.vmem [#allocation7], %s1413_s16 }
  0x3a   : > { %s2724_s13 = scalar_select %p2291_p12, 1, 0 }
  0x3b   : > { %p1612_p13 = pneg %p2291_p12  ;;  %s239_s30 = sshll.u32 %s231_s29, 4  ;;  %s2313_s30 = int_to_ptr.vmem [resolvable:$true] %s239_s30 }
  0x3c   : > { %s1976_s27 = scalar_lea.hbm %s2705_s1, 512 }
  0x3d   : > { %p2304_p0 = pnand %p1612_p13, %p2710_p10  ;;  %p1977_p3 = scmp.ne.s32.totalorder %s2705_s1, %s1976_s27 }
  0x3e   : > { %p1983_p11 = scmp.lt.u32.totalorder %s1976_s27, %s2705_s1 }
  0x3f   : > { %p1978_p1 = pneg %p2304_p0 }
  0x41   : > { %p1979_p2 = pnand %p1978_p1, %p1977_p3 }
  0x43   : > { %p1980_p5 = pneg %p1979_p2 }
  0x45   : > { %p1985_p13 = pnand %p1983_p11, %p1980_p5 }
  0x47   : > { %1988 = shalt.err (!%p1985_p13)
}
  0x48   : > { %s1989_s16 = scalar_lea.vmem %s2295_s15, 512  ;;  %p1997_p7 = scmp.lt.s32.totalorder %s2295_s15, %s2295_s15 }
  0x49   : > { %p1990_p10 = scmp.ne.s32.totalorder %s2295_s15, %s1989_s16  ;;  %p1998_p4 = scmp.lt.s32.totalorder %s1989_s16, %s1989_s16 }
  0x4b   : > { %p1992_p8 = pnand %p1990_p10, %p1978_p1  ;;  %p1999_p12 = por %p1998_p4, %p1997_p7 }
  0x4d   : > { %p1993_p9 = pneg %p1992_p8 }
  0x4f   : > { %p2000_p6 = pnand %p1999_p12, %p1993_p9 }
  0x51   : > { %2003 = shalt.err (!%p2000_p6)
}
  0x52   : > { %s2146_s0 = smov 256   ;;  %s2147_s25 = smov 16  }
  0x53   : > { %1615 = dma.hbm_to_vmem [thread:$0]  (!%p2304_p0), %s2705_s1, 512, %s2295_s15, [#allocation6], %s2146_s0, %s2146_s0, %s2147_s25  }
  0x54   : > { %s2004_s8 = scalar_lea.hbm %s2311_s28, 64  ;;  %p2726_p10 = scmp.ne.s32.totalorder %s2720_s10, 0 }
  0x55   : > { %p2005_p8 = scmp.ne.s32.totalorder %s2311_s28, %s2004_s8  ;;  %s2009_s24 = scalar_lea.hbm %s2706_s2, 128 }
  0x56   : > { %p2727_p4 = pneg %p2726_p10  ;;  %p2010_p9 = scmp.lt.u32.totalorder %s2311_s28, %s2706_s2 }
  0x57   : > { %p2011_p12 = scmp.lt.u32.totalorder %s2009_s24, %s2004_s8  ;;  %p2013_p1 = scmp.lt.u32.totalorder %s2004_s8, %s2311_s28 }
  0x58   : > { %p2007_p7 = pnand %p2005_p8, %p2727_p4 }
  0x59   : > { %p2012_p3 = por %p2011_p12, %p2010_p9 }
  0x5a   : > { %p2008_p6 = pneg %p2007_p7 }
  0x5b   : > { %p2014_p2 = por %p2013_p1, %p2012_p3 }
  0x5d   : > { %p2015_p5 = pnand %p2014_p2, %p2008_p6 }
  0x5f   : > { %2018 = shalt.err (!%p2015_p5)
}
  0x60   : > { %s2019_s15 = scalar_lea.vmem %s2313_s30, 64  ;;  %p2728_p11 = pmov %p2727_p4 }
  0x61   : > { %p2020_p0 = scmp.ne.s32.totalorder %s2313_s30, %s2019_s15  ;;  %s2148_s23 = smov [#allocation7]  }
  0x62   : > { %s2024_s0 = sshll.u32 %s2148_s23, 4  ;;  %s2025_s0 = int_to_ptr.vmem [resolvable:$false] %s2024_s0 }
  0x63   : > { %p2022_p13 = pnand %p2020_p0, %p2728_p11  ;;  %s2026_s25 = scalar_lea.vmem %s2025_s0, 128 }
  0x64   : > { %p2027_p4 = scmp.lt.s32.totalorder %s2313_s30, %s2025_s0  ;;  %p2028_p7 = scmp.lt.s32.totalorder %s2026_s25, %s2019_s15 }
  0x65   : > { %p2023_p8 = pneg %p2022_p13 }
  0x66   : > { %p2029_p9 = por %p2028_p7, %p2027_p4 }
  0x68   : > { %p2030_p12 = pnand %p2029_p9, %p2023_p8 }
  0x6a   : > { %2033 = shalt.err (!%p2030_p12)
}
  0x6b   : > { %1622 = dma.hbm_to_vmem [thread:$0]  (!%p2726_p10), %s2311_s28, 64, %s2313_s30, %s2236_s11  }
  0x6c   : > { %p2729_p6 = scmp.ne.s32.totalorder %s2724_s13, 0 }
  0x6d   : > { %s250_s17 = sand.u32 (!%p2729_p6), 1, %s2265_s6   ;;  %s2364_s29 = sand.u32 (!%p2729_p6), 1, %s2132_s19  }
  0x6e   : > { %248 = sbr.rel (%p2729_p6) target bundleno = 1200 (0x4b0), region = 36  ;;  %s1417_s8 = sshll.u32 (!%p2729_p6), %s2364_s29, 4 }
  0x6f   : > { %s251_s14 = scalar_lea.sflag (!%p2729_p6), [#allocation3], %s250_s17  ;;  %s2367_s27 = scalar_lea.vmem (!%p2729_p6), [#allocation2], %s1417_s8 }
  0x70   : > { %p2730_p3 = scmp.ne.s32.totalorder (!%p2729_p6), %s2721_s12, 0 }
  0x75   : > { %2107 = dma.done.wait (%p2730_p3), %s251_s14, 256  }
  0x76   : > { %2109 = vsyncadd (%p2730_p3), %s251_s14, 4294967040  ;;  %p2731_p10 = scmp.eq.s32.totalorder %s2265_s6, 0 }
  0x78   : > { %2111 = dma.done.wait (%p2731_p10), [#allocation6], 512   ;;  %p2732_p1 = pmov %p2731_p10 }
  0x79   : > { %s1419_s10 = sshll.u32 %s2364_s29, 2 }
  0x7a   : > { %2113 = vsyncadd (%p2732_p1), [#allocation6], 4294966784  ;;  %s2378_s11 = scalar_lea.vmem [#allocation7], %s1419_s10 }
  0x7b   : > { %2115 = dma.done.wait (%p2730_p3), %s251_s14, 64  }
  0x7c   : > { %2117 = vsyncadd (%p2730_p3), %s251_s14, 4294967232  ;;  %v2149_v0 = vmov 0   ;;  %v304_v1 = vld [vmem:[%s2367_s27] sm:$0xff]  ;;  %v305_v2 = vld [vmem:[%s2367_s27 + $0x8] sm:$0xff]  ;;  %vm372_vm0 = vcmask 130048   ;;  %v310_v25 = vlaneseq  ;;  %vm1128_vm1 = vcmask 1040384  }
  0x7d   : > { %453 = vmatprep.mubr.bf16.mxu0 %v2149_v0  ;;  %737 = vmatprep.mubr.bf16.mxu1 %v2149_v0  ;;  %v1421_v3 = vcombine.low %v304_v1, %v305_v2  ;;  %v1675_v4 = vld [vmem:[#allocation5 + $0x4] ss:$16 sps:$4 sm:$0xff]   ;;  %v1677_v5 = vld [vmem:[#allocation5 + $0xc] ss:$16 sps:$4 sm:$0xff]   ;;  %v1679_v6 = vld [vmem:[#allocation5] ss:$16 sps:$4 sm:$0xff]   ;;  %v1422_v8 = vcombine.high %v304_v1, %v305_v2 }
  0x7e   : > { %v1680_v7 = vld [vmem:[#allocation5 + $0x8] ss:$16 sps:$4 sm:$0xff]   ;;  %421 = vmatprep.subr.bf16.mxu0 %v1675_v4  ;;  %705 = vmatprep.subr.bf16.mxu1 %v1677_v5  ;;  %v2451_v26 = vshrl.u32 %v310_v25, 7  ;;  %v308_v28 = vld [vmem:[%s2378_s11] sm:$0x3]  ;;  %s1420_s23 = sshll.u32 %s2364_s29, 1 }
  0x7f   : > { %330 = vxpose.xlu0.c.b16.start.end [1/1] (short) %v1421_v3, 128  ;;  %422 = vmatpush1.bf16.msra.mxu0 %v1679_v6  ;;  %v1441_v30 = vld [vmem:[%s2378_s11 + $0x2] sm:$0x3]  ;;  %s1469_s0 = sshll.u32 %s2265_s6, 5  ;;  %s296_s25 = scalar_lea.vmem [#allocation8], %s1420_s23  ;;  %vm1168_vm2 = vcmp.lt.s32.totalorder %v310_v25, 256 }
  0x80   : > { %706 = vmatpush1.bf16.msra.mxu1 %v1680_v7  ;;  %v2454_v27 = vsub.s32 0, %v2451_v26  ;;  %v2458_v29 = vsub.s32 1, %v2451_v26  ;;  %s1265_s17 = sshll.u32 %s296_s25, 4  ;;  %s1247_s10 = scalar_lea.sflag [#allocation4], %s2364_s29  ;;  %s2631_s17 = int_to_ptr.vmem [resolvable:$true] %s1265_s17 }
  0x81   : > { %s2034_s11 = scalar_lea.vmem %s2631_s17, 32  ;;  %p2733_p5 = scmp.ne.s32.totalorder %s2722_s7, 0 }
  0x82   : > { %v2462_v31 = vrot.slane %v308_v28, %v2454_v27  ;;  %v2465_v32 = vrot.slane %v1441_v30, %v2454_v27  ;;  %v2468_v33 = vrot.slane %v308_v28, %v2458_v29  ;;  %v2471_v34 = vrot.slane %v1441_v30, %v2458_v29  ;;  %v678_v30 = vld [vmem:[%s2707_s3] sm:$0x3]  ;;  %p2035_p2 = scmp.ne.s32.totalorder %s2631_s17, %s2034_s11  ;;  %s2151_s12 = smov [#allocation8]  }
  0x83   : > { %s2038_s13 = sshll.u32 %s2151_s12, 4  ;;  %s2039_s13 = int_to_ptr.vmem [resolvable:$false] %s2038_s13 }
  0x84   : > { %p2036_p0 = pnand %p2035_p2, %p2733_p5  ;;  %s2040_s28 = scalar_lea.vmem %s2039_s13, 64 }
  0x85   : > { %p2041_p13 = scmp.lt.s32.totalorder %s2631_s17, %s2039_s13  ;;  %p2042_p8 = scmp.lt.s32.totalorder %s2040_s28, %s2034_s11 }
  0x86   : > { %p2037_p11 = pneg %p2036_p0 }
  0x87   : > { %p2043_p4 = por %p2042_p8, %p2041_p13 }
  0x89   : > { %p2044_p7 = pnand %p2043_p4, %p2037_p11 }
  0x9c   : > { %346 = vxpose.xlu0.c.b16.start.end [1/1] (short) %v1422_v8, 128 }
  0xe5   : > { %v338_v9 = vpop.trf.xlu0 }
  0xe6   : > { %1425 = vmatmul.mubr.msk.bf16.vlgmr.msra.gmra.mrb[0].mxu0 %vm372_vm0, %v338_v9  ;;  %1444 = vmatmul.mubr.msk.bf16.vlgmr.msra.gmra.mrb[0].mxu1 %vm372_vm0, %v338_v9 }
  0xe7   : > { %463 = vmatprep.mubr.bf16.mxu0 %v2149_v0  ;;  %747 = vmatprep.mubr.bf16.mxu1 %v2149_v0 }
  0xe9   : > { %v339_v10 = vpop.trf.xlu0 }
  0xed   : > { %v340_v11 = vpop.trf.xlu0 }
  0xee   : > { %1426 = vmatmul.mubr.msk.bf16.gmra.mrb[4].mxu0 %vm372_vm0, %v339_v10  ;;  %1445 = vmatmul.mubr.msk.bf16.gmra.mrb[4].mxu1 %vm372_vm0, %v339_v10 }
  0xef   : > { %473 = vmatprep.mubr.bf16.mxu0 %v2149_v0  ;;  %757 = vmatprep.mubr.bf16.mxu1 %v2149_v0 }
  0xf1   : > { %v341_v12 = vpop.trf.xlu0 }
  0xf5   : > { %v342_v13 = vpop.trf.xlu0 }
  0xf6   : > { %1427 = vmatmul.mubr.msk.bf16.gmra.mrb[8].mxu0 %vm372_vm0, %v340_v11  ;;  %1446 = vmatmul.mubr.msk.bf16.gmra.mrb[8].mxu1 %vm372_vm0, %v340_v11 }
  0xf7   : > { %483 = vmatprep.mubr.bf16.mxu0 %v2149_v0  ;;  %767 = vmatprep.mubr.bf16.mxu1 %v2149_v0 }
  0xf9   : > { %v343_v14 = vpop.trf.xlu0 }
  0xfd   : > { %v344_v15 = vpop.trf.xlu0 }
  0xfe   : > { %1428 = vmatmul.mubr.msk.bf16.gmra.mrb[12].mxu0 %vm372_vm0, %v341_v12  ;;  %1447 = vmatmul.mubr.msk.bf16.gmra.mrb[12].mxu1 %vm372_vm0, %v341_v12 }
  0xff   : > { %493 = vmatprep.mubr.bf16.mxu0 %v2149_v0  ;;  %777 = vmatprep.mubr.bf16.mxu1 %v2149_v0 }
 0x101   : > { %v345_v16 = vpop.trf.xlu0 }
 0x105   : > { %v354_v17 = vpop.trf.xlu0 }
 0x106   : > { %1429 = vmatmul.mubr.msk.bf16.gmra.mrb[16].mxu0 %vm372_vm0, %v342_v13  ;;  %1448 = vmatmul.mubr.msk.bf16.gmra.mrb[16].mxu1 %vm372_vm0, %v342_v13 }
 0x107   : > { %503 = vmatprep.mubr.bf16.mxu0 %v2149_v0  ;;  %787 = vmatprep.mubr.bf16.mxu1 %v2149_v0 }
 0x109   : > { %v355_v18 = vpop.trf.xlu0 }
 0x10d   : > { %v356_v19 = vpop.trf.xlu0 }
 0x10e   : > { %1430 = vmatmul.mubr.msk.bf16.gmra.mrb[20].mxu0 %vm372_vm0, %v343_v14  ;;  %1449 = vmatmul.mubr.msk.bf16.gmra.mrb[20].mxu1 %vm372_vm0, %v343_v14 }
 0x10f   : > { %513 = vmatprep.mubr.bf16.mxu0 %v2149_v0  ;;  %797 = vmatprep.mubr.bf16.mxu1 %v2149_v0 }
 0x111   : > { %v357_v20 = vpop.trf.xlu0 }
 0x115   : > { %v358_v21 = vpop.trf.xlu0 }
 0x116   : > { %1431 = vmatmul.mubr.msk.bf16.gmra.mrb[24].mxu0 %vm372_vm0, %v344_v15  ;;  %1450 = vmatmul.mubr.msk.bf16.gmra.mrb[24].mxu1 %vm372_vm0, %v344_v15 }
 0x117   : > { %523 = vmatprep.mubr.bf16.mxu0 %v2149_v0  ;;  %807 = vmatprep.mubr.bf16.mxu1 %v2149_v0 }
 0x119   : > { %v359_v22 = vpop.trf.xlu0 }
 0x11d   : > { %v360_v23 = vpop.trf.xlu0 }
 0x11e   : > { %1432 = vmatmul.mubr.msk.bf16.gmra.mrb[28].mxu0 %vm372_vm0, %v345_v16  ;;  %1451 = vmatmul.mubr.msk.bf16.gmra.mrb[28].mxu1 %vm372_vm0, %v345_v16 }
 0x11f   : > { %533 = vmatprep.mubr.bf16.mxu0 %v2149_v0  ;;  %817 = vmatprep.mubr.bf16.mxu1 %v2149_v0 }
 0x121   : > { %v361_v24 = vpop.trf.xlu0 }
 0x126   : > { %1433 = vmatmul.mubr.msk.bf16.gmra.mrb[32].mxu0 %vm372_vm0, %v354_v17  ;;  %1452 = vmatmul.mubr.msk.bf16.gmra.mrb[32].mxu1 %vm372_vm0, %v354_v17 }
 0x127   : > { %543 = vmatprep.mubr.bf16.mxu0 %v2149_v0  ;;  %827 = vmatprep.mubr.bf16.mxu1 %v2149_v0 }
 0x12e   : > { %1434 = vmatmul.mubr.msk.bf16.gmra.mrb[36].mxu0 %vm372_vm0, %v355_v18  ;;  %1453 = vmatmul.mubr.msk.bf16.gmra.mrb[36].mxu1 %vm372_vm0, %v355_v18 }
 0x12f   : > { %553 = vmatprep.mubr.bf16.mxu0 %v2149_v0  ;;  %837 = vmatprep.mubr.bf16.mxu1 %v2149_v0 }
 0x136   : > { %1435 = vmatmul.mubr.msk.bf16.gmra.mrb[40].mxu0 %vm372_vm0, %v356_v19  ;;  %1454 = vmatmul.mubr.msk.bf16.gmra.mrb[40].mxu1 %vm372_vm0, %v356_v19 }
 0x137   : > { %563 = vmatprep.mubr.bf16.mxu0 %v2149_v0  ;;  %847 = vmatprep.mubr.bf16.mxu1 %v2149_v0 }
 0x13e   : > { %1436 = vmatmul.mubr.msk.bf16.gmra.mrb[44].mxu0 %vm372_vm0, %v357_v20  ;;  %1455 = vmatmul.mubr.msk.bf16.gmra.mrb[44].mxu1 %vm372_vm0, %v357_v20  ;;  %v1460_v20 = vld [vmem:[%s2707_s3 + $0x2] sm:$0x3] }
 0x13f   : > { %573 = vmatprep.mubr.bf16.mxu0 %v2149_v0  ;;  %857 = vmatprep.mubr.bf16.mxu1 %v2149_v0 }
 0x146   : > { %1437 = vmatmul.mubr.msk.bf16.gmra.mrb[48].mxu0 %vm372_vm0, %v358_v21  ;;  %1456 = vmatmul.mubr.msk.bf16.gmra.mrb[48].mxu1 %vm372_vm0, %v358_v21 }
 0x147   : > { %583 = vmatprep.mubr.bf16.mxu0 %v2149_v0  ;;  %867 = vmatprep.mubr.bf16.mxu1 %v2149_v0 }
 0x14e   : > { %1438 = vmatmul.mubr.msk.bf16.gmra.mrb[52].mxu0 %vm372_vm0, %v359_v22  ;;  %1457 = vmatmul.mubr.msk.bf16.gmra.mrb[52].mxu1 %vm372_vm0, %v359_v22 }
 0x14f   : > { %593 = vmatprep.mubr.bf16.mxu0 %v2149_v0  ;;  %877 = vmatprep.mubr.bf16.mxu1 %v2149_v0 }
 0x156   : > { %1439 = vmatmul.mubr.msk.bf16.gmra.mrb[56].mxu0 %vm372_vm0, %v360_v23  ;;  %1458 = vmatmul.mubr.msk.bf16.gmra.mrb[56].mxu1 %vm372_vm0, %v360_v23 }
 0x157   : > { %603 = vmatprep.mubr.bf16.mxu0 %v2149_v0  ;;  %887 = vmatprep.mubr.bf16.mxu1 %v2149_v0 }
 0x15e   : > { %1440 = vmatmul.mubr.msk.bf16.gmra.mrb[60].mxu0 %vm372_vm0, %v361_v24  ;;  %1459 = vmatmul.mubr.msk.bf16.gmra.mrb[60].mxu1 %vm372_vm0, %v361_v24 }
 0x1b9   : > { %v455_v35 = vpop.f32.mrb[0].mxu0  ;;  %v739_v36 = vpop.f32.mrb[0].mxu1 }
 0x1ba   : > { %v456_v37 = vadd.f32 %v455_v35, %v2462_v31  ;;  %v740_v38 = vadd.f32 %v739_v36, %v2465_v32  ;;  %v457_v39 = vpop.f32.mrb[1].mxu0  ;;  %v741_v40 = vpop.f32.mrb[1].mxu1 }
 0x1bb   : > { %v458_v41 = vadd.f32 %v457_v39, %v2468_v33  ;;  %v742_v42 = vadd.f32 %v741_v40, %v2471_v34  ;;  %v459_v43 = vpop.f32.mrb[2].mxu0  ;;  %v743_v44 = vpop.f32.mrb[2].mxu1 }
 0x1bc   : > { %1681 = vtanh.f32 %v456_v37  ;;  %v460_v45 = vadd.f32 %v459_v43, %v2462_v31  ;;  %v461_v46 = vpop.f32.mrb[3].mxu0  ;;  %v745_v47 = vpop.f32.mrb[3].mxu1  ;;  %v744_v48 = vadd.f32 %v743_v44, %v2465_v32  ;;  %v1054_v44 = vrot.slane %v678_v30, %v2458_v29 }
 0x1bd   : > { %1683 = vtanh.f32 %v740_v38  ;;  %v462_v49 = vadd.f32 %v461_v46, %v2468_v33  ;;  %v746_v50 = vadd.f32 %v745_v47, %v2471_v34 }
 0x1be   : > { %1685 = vtanh.f32 %v458_v41  ;;  %v972_v41 = vrot.slane %v1460_v20, %v2458_v29  ;;  %1121 = vmatprep.mubr.f32.mxu0 %v1054_v44 }
 0x1bf   : > { %1687 = vtanh.f32 %v742_v42 }
 0x1c0   : > { %1689 = vtanh.f32 %v460_v45  ;;  %1039 = vmatprep.mubr.f32.mxu1 %v972_v41 }
 0x1c1   : > { %1691 = vtanh.f32 %v744_v48  ;;  %v465_v51 = vpop.f32.mrb[4].mxu0  ;;  %v749_v52 = vpop.f32.mrb[4].mxu1 }
 0x1c2   : > { %1693 = vtanh.f32 %v462_v49  ;;  %v466_v53 = vadd.f32 %v465_v51, %v2462_v31  ;;  %v750_v54 = vadd.f32 %v749_v52, %v2465_v32  ;;  %v467_v55 = vpop.f32.mrb[5].mxu0  ;;  %v751_v56 = vpop.f32.mrb[5].mxu1 }
 0x1c3   : > { %1695 = vtanh.f32 %v746_v50  ;;  %v468_v57 = vadd.f32 %v467_v55, %v2468_v33  ;;  %v752_v58 = vadd.f32 %v751_v56, %v2471_v34  ;;  %v469_v59 = vpop.f32.mrb[6].mxu0  ;;  %v753_v60 = vpop.f32.mrb[6].mxu1 }
 0x1c4   : > { %1697 = vtanh.f32 %v466_v53  ;;  %v470_v61 = vadd.f32 %v469_v59, %v2462_v31  ;;  %v471_v62 = vpop.f32.mrb[7].mxu0  ;;  %v755_v63 = vpop.f32.mrb[7].mxu1  ;;  %v754_v0 = vadd.f32 %v753_v60, %v2465_v32 }
 0x1c5   : > { %1699 = vtanh.f32 %v750_v54  ;;  %v472_v2 = vadd.f32 %v471_v62, %v2468_v33  ;;  %v756_v4 = vadd.f32 %v755_v63, %v2471_v34 }
 0x1c6   : > { %v1682_v1 = vpop.eup %1681  ;;  %1701 = vtanh.f32 %v468_v57 }
 0x1c7   : > { %v1684_v3 = vpop.eup %1683  ;;  %1703 = vtanh.f32 %v752_v58 }
 0x1c8   : > { %v1686_v5 = vpop.eup %1685  ;;  %1705 = vtanh.f32 %v470_v61 }
 0x1c9   : > { %v1688_v6 = vpop.eup %1687  ;;  %1707 = vtanh.f32 %v754_v0  ;;  %v475_v7 = vpop.f32.mrb[8].mxu0 }
 0x1ca   : > { %v759_v8 = vpop.f32.mrb[8].mxu1  ;;  %v1690_v9 = vpop.eup %1689  ;;  %1709 = vtanh.f32 %v472_v2  ;;  %v476_v10 = vadd.f32 %v475_v7, %v2462_v31 }
 0x1cb   : > { %v760_v11 = vadd.f32 %v759_v8, %v2465_v32  ;;  %v477_v12 = vpop.f32.mrb[9].mxu0  ;;  %v761_v13 = vpop.f32.mrb[9].mxu1  ;;  %1711 = vtanh.f32 %v756_v4  ;;  %v1536_v19 = vpack.c.bf16 %v1690_v9, %v1682_v1 }
 0x1cc   : > { %v1692_v14 = vpop.eup %1691  ;;  %v478_v15 = vadd.f32 %v477_v12, %v2468_v33  ;;  %v762_v16 = vadd.f32 %v761_v13, %v2471_v34  ;;  %v479_v17 = vpop.f32.mrb[10].mxu0  ;;  %1713 = vtanh.f32 %v476_v10 }
 0x1cd   : > { %v763_v18 = vpop.f32.mrb[10].mxu1  ;;  %v1694_v21 = vpop.eup %1693  ;;  %v480_v22 = vadd.f32 %v479_v17, %v2462_v31  ;;  %v1472_v28 = vpack.c.bf16 %v1692_v14, %v1684_v3  ;;  %1715 = vtanh.f32 %v760_v11 }
 0x1ce   : > { %v481_v23 = vpop.f32.mrb[11].mxu0  ;;  %v765_v24 = vpop.f32.mrb[11].mxu1  ;;  %v764_v36 = vadd.f32 %v763_v18, %v2465_v32  ;;  %v1534_v37 = vpack.c.bf16 %v1694_v21, %v1686_v5  ;;  %1717 = vtanh.f32 %v478_v15 }
 0x1cf   : > { %v1696_v35 = vpop.eup %1695  ;;  %v482_v39 = vadd.f32 %v481_v23, %v2468_v33  ;;  %1719 = vtanh.f32 %v762_v16  ;;  %v766_v43 = vadd.f32 %v765_v24, %v2471_v34 }
 0x1d0   : > { %v1698_v38 = vpop.eup %1697  ;;  %v1470_v40 = vpack.c.bf16 %v1696_v35, %v1688_v6  ;;  %1535 = vmatprep.subr.bf16.mxu0 %v1534_v37  ;;  %1721 = vtanh.f32 %v480_v22 }
 0x1d1   : > { %v1700_v42 = vpop.eup %1699  ;;  %1537 = vmatpush1.bf16.xpose.msra.mxu0 %v1536_v19  ;;  %1723 = vtanh.f32 %v764_v36  ;;  %v485_v47 = vpop.f32.mrb[12].mxu0 }
 0x1d2   : > { %v1702_v45 = vpop.eup %1701  ;;  %1471 = vmatprep.subr.bf16.mxu1 %v1470_v40  ;;  %v769_v48 = vpop.f32.mrb[12].mxu1  ;;  %1725 = vtanh.f32 %v482_v39  ;;  %v486_v50 = vadd.f32 %v485_v47, %v2462_v31 }
 0x1d3   : > { %v1704_v46 = vpop.eup %1703  ;;  %1473 = vmatpush1.bf16.xpose.msra.mxu1 %v1472_v28  ;;  %v770_v51 = vadd.f32 %v769_v48, %v2465_v32  ;;  %v487_v52 = vpop.f32.mrb[13].mxu0  ;;  %1727 = vtanh.f32 %v766_v43 }
 0x1d4   : > { %v1706_v49 = vpop.eup %1705  ;;  %v771_v53 = vpop.f32.mrb[13].mxu1  ;;  %v488_v54 = vadd.f32 %v487_v52, %v2468_v33  ;;  %1729 = vtanh.f32 %v486_v50 }
 0x1d5   : > { %v1708_v29 = vpop.eup %1707  ;;  %v772_v55 = vadd.f32 %v771_v53, %v2471_v34  ;;  %v489_v56 = vpop.f32.mrb[14].mxu0  ;;  %v1540_v58 = vpack.c.bf16 %v1706_v49, %v1698_v38  ;;  %1731 = vtanh.f32 %v770_v51 }
 0x1d6   : > { %v773_v57 = vpop.f32.mrb[14].mxu1  ;;  %v1710_v59 = vpop.eup %1709  ;;  %v490_v60 = vadd.f32 %v489_v56, %v2462_v31  ;;  %v1476_v63 = vpack.c.bf16 %v1708_v29, %v1700_v42  ;;  %1733 = vtanh.f32 %v488_v54 }
 0x1d7   : > { %v491_v61 = vpop.f32.mrb[15].mxu0  ;;  %v775_v62 = vpop.f32.mrb[15].mxu1  ;;  %v774_v1 = vadd.f32 %v773_v57, %v2465_v32  ;;  %v1538_v2 = vpack.c.bf16 %v1710_v59, %v1702_v45  ;;  %1735 = vtanh.f32 %v772_v55 }
 0x1d8   : > { %v1712_v0 = vpop.eup %1711  ;;  %v492_v4 = vadd.f32 %v491_v61, %v2468_v33  ;;  %v776_v7 = vadd.f32 %v775_v62, %v2471_v34  ;;  %1737 = vtanh.f32 %v490_v60 }
 0x1d9   : > { %v1714_v3 = vpop.eup %1713  ;;  %v1474_v5 = vpack.c.bf16 %v1712_v0, %v1704_v46  ;;  %1539 = vmatprep.subr.bf16.mxu0 %v1538_v2  ;;  %1739 = vtanh.f32 %v774_v1  ;;  %v495_v10 = vpop.f32.mrb[16].mxu0 }
 0x1da   : > { %v1716_v6 = vpop.eup %1715  ;;  %1541 = vmatpush1.bf16.xpose.msra.mxu0 %v1540_v58  ;;  %v779_v11 = vpop.f32.mrb[16].mxu1  ;;  %1741 = vtanh.f32 %v492_v4  ;;  %v496_v13 = vadd.f32 %v495_v10, %v2462_v31 }
 0x1db   : > { %v1718_v8 = vpop.eup %1717  ;;  %1475 = vmatprep.subr.bf16.mxu1 %v1474_v5  ;;  %v780_v14 = vadd.f32 %v779_v11, %v2465_v32  ;;  %v497_v15 = vpop.f32.mrb[17].mxu0  ;;  %1743 = vtanh.f32 %v776_v7 }
 0x1dc   : > { %v1720_v9 = vpop.eup %1719  ;;  %1477 = vmatpush1.bf16.xpose.msra.mxu1 %v1476_v63  ;;  %v781_v16 = vpop.f32.mrb[17].mxu1  ;;  %v498_v18 = vadd.f32 %v497_v15, %v2468_v33  ;;  %1745 = vtanh.f32 %v496_v13 }
 0x1dd   : > { %v1722_v12 = vpop.eup %1721  ;;  %v782_v19 = vadd.f32 %v781_v16, %v2471_v34  ;;  %v499_v20 = vpop.f32.mrb[18].mxu0  ;;  %1747 = vtanh.f32 %v780_v14 }
 0x1de   : > { %v1724_v17 = vpop.eup %1723  ;;  %v783_v21 = vpop.f32.mrb[18].mxu1  ;;  %v1544_v22 = vpack.c.bf16 %v1722_v12, %v1714_v3  ;;  %v500_v24 = vadd.f32 %v499_v20, %v2462_v31  ;;  %1749 = vtanh.f32 %v498_v18 }
 0x1df   : > { %v1726_v23 = vpop.eup %1725  ;;  %v501_v28 = vpop.f32.mrb[19].mxu0  ;;  %v1480_v35 = vpack.c.bf16 %v1724_v17, %v1716_v6  ;;  %v784_v37 = vadd.f32 %v783_v21, %v2465_v32  ;;  %1751 = vtanh.f32 %v782_v19 }
 0x1e0   : > { %v785_v30 = vpop.f32.mrb[19].mxu1  ;;  %v1728_v36 = vpop.eup %1727  ;;  %v1542_v38 = vpack.c.bf16 %v1726_v23, %v1718_v8  ;;  %v502_v40 = vadd.f32 %v501_v28, %v2468_v33  ;;  %1753 = vtanh.f32 %v500_v24 }
 0x1e1   : > { %v1730_v39 = vpop.eup %1729  ;;  %v1478_v41 = vpack.c.bf16 %v1728_v36, %v1720_v9  ;;  %v786_v43 = vadd.f32 %v785_v30, %v2471_v34  ;;  %1755 = vtanh.f32 %v784_v37  ;;  %v505_v46 = vpop.f32.mrb[20].mxu0 }
 0x1e2   : > { %v1732_v42 = vpop.eup %1731  ;;  %1543 = vmatprep.subr.bf16.mxu0 %v1542_v38  ;;  %v789_v47 = vpop.f32.mrb[20].mxu1  ;;  %1757 = vtanh.f32 %v502_v40  ;;  %v506_v49 = vadd.f32 %v505_v46, %v2462_v31 }
 0x1e3   : > { %v1734_v44 = vpop.eup %1733  ;;  %1479 = vmatprep.subr.bf16.mxu1 %v1478_v41  ;;  %1545 = vmatpush1.bf16.xpose.msra.mxu0 %v1544_v22  ;;  %v790_v50 = vadd.f32 %v789_v47, %v2465_v32  ;;  %v507_v51 = vpop.f32.mrb[21].mxu0  ;;  %1759 = vtanh.f32 %v786_v43 }
 0x1e4   : > { %v1736_v45 = vpop.eup %1735  ;;  %1481 = vmatpush1.bf16.xpose.msra.mxu1 %v1480_v35  ;;  %v791_v52 = vpop.f32.mrb[21].mxu1  ;;  %v508_v29 = vadd.f32 %v507_v51, %v2468_v33  ;;  %1761 = vtanh.f32 %v506_v49 }
 0x1e5   : > { %v1738_v48 = vpop.eup %1737  ;;  %v792_v54 = vadd.f32 %v791_v52, %v2471_v34  ;;  %v509_v55 = vpop.f32.mrb[22].mxu0  ;;  %1763 = vtanh.f32 %v790_v50 }
 0x1e6   : > { %v1740_v53 = vpop.eup %1739  ;;  %v793_v56 = vpop.f32.mrb[22].mxu1  ;;  %v1548_v57 = vpack.c.bf16 %v1738_v48, %v1730_v39  ;;  %v510_v59 = vadd.f32 %v509_v55, %v2462_v31  ;;  %1765 = vtanh.f32 %v508_v29 }
 0x1e7   : > { %v1742_v58 = vpop.eup %1741  ;;  %v511_v60 = vpop.f32.mrb[23].mxu0  ;;  %v1484_v62 = vpack.c.bf16 %v1740_v53, %v1732_v42  ;;  %v794_v0 = vadd.f32 %v793_v56, %v2465_v32  ;;  %1767 = vtanh.f32 %v792_v54 }
 0x1e8   : > { %v795_v61 = vpop.f32.mrb[23].mxu1  ;;  %v1744_v63 = vpop.eup %1743  ;;  %v1546_v1 = vpack.c.bf16 %v1742_v58, %v1734_v44  ;;  %v512_v3 = vadd.f32 %v511_v60, %v2468_v33  ;;  %1769 = vtanh.f32 %v510_v59 }
 0x1e9   : > { %v1746_v2 = vpop.eup %1745  ;;  %v1482_v4 = vpack.c.bf16 %v1744_v63, %v1736_v45  ;;  %v796_v6 = vadd.f32 %v795_v61, %v2471_v34  ;;  %1771 = vtanh.f32 %v794_v0  ;;  %v515_v9 = vpop.f32.mrb[24].mxu0 }
 0x1ea   : > { %v1748_v5 = vpop.eup %1747  ;;  %1547 = vmatprep.subr.bf16.mxu0 %v1546_v1  ;;  %v799_v10 = vpop.f32.mrb[24].mxu1  ;;  %1773 = vtanh.f32 %v512_v3  ;;  %v516_v12 = vadd.f32 %v515_v9, %v2462_v31 }
 0x1eb   : > { %v1750_v7 = vpop.eup %1749  ;;  %1483 = vmatprep.subr.bf16.mxu1 %v1482_v4  ;;  %1549 = vmatpush1.bf16.xpose.msra.mxu0 %v1548_v57  ;;  %v800_v13 = vadd.f32 %v799_v10, %v2465_v32  ;;  %v517_v14 = vpop.f32.mrb[25].mxu0  ;;  %1775 = vtanh.f32 %v796_v6 }
 0x1ec   : > { %v1752_v8 = vpop.eup %1751  ;;  %1485 = vmatpush1.bf16.xpose.msra.mxu1 %v1484_v62  ;;  %v801_v15 = vpop.f32.mrb[25].mxu1  ;;  %v518_v17 = vadd.f32 %v517_v14, %v2468_v33  ;;  %1777 = vtanh.f32 %v516_v12 }
 0x1ed   : > { %v1754_v11 = vpop.eup %1753  ;;  %v802_v18 = vadd.f32 %v801_v15, %v2471_v34  ;;  %v519_v19 = vpop.f32.mrb[26].mxu0  ;;  %1779 = vtanh.f32 %v800_v13 }
 0x1ee   : > { %v1756_v16 = vpop.eup %1755  ;;  %v803_v20 = vpop.f32.mrb[26].mxu1  ;;  %v1552_v21 = vpack.c.bf16 %v1754_v11, %v1746_v2  ;;  %v520_v23 = vadd.f32 %v519_v19, %v2462_v31  ;;  %1781 = vtanh.f32 %v518_v17 }
 0x1ef   : > { %v1758_v22 = vpop.eup %1757  ;;  %v521_v24 = vpop.f32.mrb[27].mxu0  ;;  %v1488_v30 = vpack.c.bf16 %v1756_v16, %v1748_v5  ;;  %v804_v36 = vadd.f32 %v803_v20, %v2465_v32  ;;  %1783 = vtanh.f32 %v802_v18 }
 0x1f0   : > { %v805_v28 = vpop.f32.mrb[27].mxu1  ;;  %v1760_v35 = vpop.eup %1759  ;;  %v1550_v37 = vpack.c.bf16 %v1758_v22, %v1750_v7  ;;  %v522_v39 = vadd.f32 %v521_v24, %v2468_v33  ;;  %1785 = vtanh.f32 %v520_v23 }
 0x1f1   : > { %v1762_v38 = vpop.eup %1761  ;;  %v1486_v40 = vpack.c.bf16 %v1760_v35, %v1752_v8  ;;  %v806_v42 = vadd.f32 %v805_v28, %v2471_v34  ;;  %1787 = vtanh.f32 %v804_v36  ;;  %v525_v45 = vpop.f32.mrb[28].mxu0 }
 0x1f2   : > { %v1764_v41 = vpop.eup %1763  ;;  %1551 = vmatprep.subr.bf16.mxu0 %v1550_v37  ;;  %v809_v46 = vpop.f32.mrb[28].mxu1  ;;  %1789 = vtanh.f32 %v522_v39  ;;  %v526_v48 = vadd.f32 %v525_v45, %v2462_v31 }
 0x1f3   : > { %v1766_v43 = vpop.eup %1765  ;;  %1487 = vmatprep.subr.bf16.mxu1 %v1486_v40  ;;  %1553 = vmatpush1.bf16.xpose.msra.mxu0 %v1552_v21  ;;  %v810_v49 = vadd.f32 %v809_v46, %v2465_v32  ;;  %v527_v50 = vpop.f32.mrb[29].mxu0  ;;  %1791 = vtanh.f32 %v806_v42 }
 0x1f4   : > { %v1768_v44 = vpop.eup %1767  ;;  %1489 = vmatpush1.bf16.xpose.msra.mxu1 %v1488_v30  ;;  %v811_v51 = vpop.f32.mrb[29].mxu1  ;;  %v528_v53 = vadd.f32 %v527_v50, %v2468_v33  ;;  %1793 = vtanh.f32 %v526_v48 }
 0x1f5   : > { %v1770_v47 = vpop.eup %1769  ;;  %v812_v29 = vadd.f32 %v811_v51, %v2471_v34  ;;  %v529_v54 = vpop.f32.mrb[30].mxu0  ;;  %1795 = vtanh.f32 %v810_v49 }
 0x1f6   : > { %v1772_v52 = vpop.eup %1771  ;;  %v813_v55 = vpop.f32.mrb[30].mxu1  ;;  %v1556_v56 = vpack.c.bf16 %v1770_v47, %v1762_v38  ;;  %v530_v58 = vadd.f32 %v529_v54, %v2462_v31  ;;  %1797 = vtanh.f32 %v528_v53 }
 0x1f7   : > { %v1774_v57 = vpop.eup %1773  ;;  %v531_v59 = vpop.f32.mrb[31].mxu0  ;;  %v1492_v61 = vpack.c.bf16 %v1772_v52, %v1764_v41  ;;  %v814_v63 = vadd.f32 %v813_v55, %v2465_v32  ;;  %1799 = vtanh.f32 %v812_v29 }
 0x1f8   : > { %v815_v60 = vpop.f32.mrb[31].mxu1  ;;  %v1776_v62 = vpop.eup %1775  ;;  %v1554_v0 = vpack.c.bf16 %v1774_v57, %v1766_v43  ;;  %v532_v2 = vadd.f32 %v531_v59, %v2468_v33  ;;  %1801 = vtanh.f32 %v530_v58 }
 0x1f9   : > { %v1778_v1 = vpop.eup %1777  ;;  %v1490_v3 = vpack.c.bf16 %v1776_v62, %v1768_v44  ;;  %v816_v5 = vadd.f32 %v815_v60, %v2471_v34  ;;  %1803 = vtanh.f32 %v814_v63  ;;  %v535_v8 = vpop.f32.mrb[32].mxu0 }
 0x1fa   : > { %v1780_v4 = vpop.eup %1779  ;;  %1555 = vmatprep.subr.bf16.mxu0 %v1554_v0  ;;  %v819_v9 = vpop.f32.mrb[32].mxu1  ;;  %1805 = vtanh.f32 %v532_v2  ;;  %v536_v11 = vadd.f32 %v535_v8, %v2462_v31 }
 0x1fb   : > { %v1782_v6 = vpop.eup %1781  ;;  %1491 = vmatprep.subr.bf16.mxu1 %v1490_v3  ;;  %1557 = vmatpush1.bf16.xpose.msra.mxu0 %v1556_v56  ;;  %v820_v12 = vadd.f32 %v819_v9, %v2465_v32  ;;  %v537_v13 = vpop.f32.mrb[33].mxu0  ;;  %1807 = vtanh.f32 %v816_v5 }
 0x1fc   : > { %v1784_v7 = vpop.eup %1783  ;;  %1493 = vmatpush1.bf16.xpose.msra.mxu1 %v1492_v61  ;;  %v821_v14 = vpop.f32.mrb[33].mxu1  ;;  %v538_v16 = vadd.f32 %v537_v13, %v2468_v33  ;;  %1809 = vtanh.f32 %v536_v11 }
 0x1fd   : > { %v1786_v10 = vpop.eup %1785  ;;  %v822_v17 = vadd.f32 %v821_v14, %v2471_v34  ;;  %v539_v18 = vpop.f32.mrb[34].mxu0  ;;  %1811 = vtanh.f32 %v820_v12 }
 0x1fe   : > { %v1788_v15 = vpop.eup %1787  ;;  %v823_v19 = vpop.f32.mrb[34].mxu1  ;;  %v1560_v20 = vpack.c.bf16 %v1786_v10, %v1778_v1  ;;  %v540_v22 = vadd.f32 %v539_v18, %v2462_v31  ;;  %1813 = vtanh.f32 %v538_v16 }
 0x1ff   : > { %v1790_v21 = vpop.eup %1789  ;;  %v541_v23 = vpop.f32.mrb[35].mxu0  ;;  %v1496_v28 = vpack.c.bf16 %v1788_v15, %v1780_v4  ;;  %v824_v35 = vadd.f32 %v823_v19, %v2465_v32  ;;  %1815 = vtanh.f32 %v822_v17 }
 0x200   : > { %v825_v24 = vpop.f32.mrb[35].mxu1  ;;  %v1792_v30 = vpop.eup %1791  ;;  %v1558_v36 = vpack.c.bf16 %v1790_v21, %v1782_v6  ;;  %v542_v38 = vadd.f32 %v541_v23, %v2468_v33  ;;  %1817 = vtanh.f32 %v540_v22 }
 0x201   : > { %v1794_v37 = vpop.eup %1793  ;;  %v1494_v39 = vpack.c.bf16 %v1792_v30, %v1784_v7  ;;  %v826_v41 = vadd.f32 %v825_v24, %v2471_v34  ;;  %1819 = vtanh.f32 %v824_v35  ;;  %v545_v44 = vpop.f32.mrb[36].mxu0 }
 0x202   : > { %v1796_v40 = vpop.eup %1795  ;;  %1559 = vmatprep.subr.bf16.mxu0 %v1558_v36  ;;  %v829_v45 = vpop.f32.mrb[36].mxu1  ;;  %1821 = vtanh.f32 %v542_v38  ;;  %v546_v47 = vadd.f32 %v545_v44, %v2462_v31 }
 0x203   : > { %v1798_v42 = vpop.eup %1797  ;;  %1495 = vmatprep.subr.bf16.mxu1 %v1494_v39  ;;  %1561 = vmatpush1.bf16.xpose.msra.mxu0 %v1560_v20  ;;  %v830_v48 = vadd.f32 %v829_v45, %v2465_v32  ;;  %v547_v49 = vpop.f32.mrb[37].mxu0  ;;  %1823 = vtanh.f32 %v826_v41 }
 0x204   : > { %v1800_v43 = vpop.eup %1799  ;;  %1497 = vmatpush1.bf16.xpose.msra.mxu1 %v1496_v28  ;;  %v831_v50 = vpop.f32.mrb[37].mxu1  ;;  %v548_v52 = vadd.f32 %v547_v49, %v2468_v33  ;;  %1825 = vtanh.f32 %v546_v47 }
 0x205   : > { %v1802_v46 = vpop.eup %1801  ;;  %v832_v53 = vadd.f32 %v831_v50, %v2471_v34  ;;  %v549_v29 = vpop.f32.mrb[38].mxu0  ;;  %1827 = vtanh.f32 %v830_v48 }
 0x206   : > { %v1804_v51 = vpop.eup %1803  ;;  %v833_v54 = vpop.f32.mrb[38].mxu1  ;;  %v1564_v55 = vpack.c.bf16 %v1802_v46, %v1794_v37  ;;  %v550_v57 = vadd.f32 %v549_v29, %v2462_v31  ;;  %1829 = vtanh.f32 %v548_v52 }
 0x207   : > { %v1806_v56 = vpop.eup %1805  ;;  %v551_v58 = vpop.f32.mrb[39].mxu0  ;;  %v1500_v60 = vpack.c.bf16 %v1804_v51, %v1796_v40  ;;  %v834_v62 = vadd.f32 %v833_v54, %v2465_v32  ;;  %1831 = vtanh.f32 %v832_v53 }
 0x208   : > { %v835_v59 = vpop.f32.mrb[39].mxu1  ;;  %v1808_v61 = vpop.eup %1807  ;;  %v1562_v63 = vpack.c.bf16 %v1806_v56, %v1798_v42  ;;  %v552_v1 = vadd.f32 %v551_v58, %v2468_v33  ;;  %1833 = vtanh.f32 %v550_v57 }
 0x209   : > { %v1810_v0 = vpop.eup %1809  ;;  %v1498_v2 = vpack.c.bf16 %v1808_v61, %v1800_v43  ;;  %v836_v4 = vadd.f32 %v835_v59, %v2471_v34  ;;  %1835 = vtanh.f32 %v834_v62  ;;  %v555_v7 = vpop.f32.mrb[40].mxu0 }
 0x20a   : > { %v1812_v3 = vpop.eup %1811  ;;  %1563 = vmatprep.subr.bf16.mxu0 %v1562_v63  ;;  %v839_v8 = vpop.f32.mrb[40].mxu1  ;;  %1837 = vtanh.f32 %v552_v1  ;;  %v556_v10 = vadd.f32 %v555_v7, %v2462_v31 }
 0x20b   : > { %v1814_v5 = vpop.eup %1813  ;;  %1499 = vmatprep.subr.bf16.mxu1 %v1498_v2  ;;  %1565 = vmatpush1.bf16.xpose.msra.mxu0 %v1564_v55  ;;  %v840_v11 = vadd.f32 %v839_v8, %v2465_v32  ;;  %v557_v12 = vpop.f32.mrb[41].mxu0  ;;  %1839 = vtanh.f32 %v836_v4 }
 0x20c   : > { %v1816_v6 = vpop.eup %1815  ;;  %1501 = vmatpush1.bf16.xpose.msra.mxu1 %v1500_v60  ;;  %v841_v13 = vpop.f32.mrb[41].mxu1  ;;  %v558_v15 = vadd.f32 %v557_v12, %v2468_v33  ;;  %1841 = vtanh.f32 %v556_v10 }
 0x20d   : > { %v1818_v9 = vpop.eup %1817  ;;  %v842_v16 = vadd.f32 %v841_v13, %v2471_v34  ;;  %v559_v17 = vpop.f32.mrb[42].mxu0  ;;  %1843 = vtanh.f32 %v840_v11 }
 0x20e   : > { %v1820_v14 = vpop.eup %1819  ;;  %v843_v18 = vpop.f32.mrb[42].mxu1  ;;  %v1568_v19 = vpack.c.bf16 %v1818_v9, %v1810_v0  ;;  %v560_v21 = vadd.f32 %v559_v17, %v2462_v31  ;;  %1845 = vtanh.f32 %v558_v15 }
 0x20f   : > { %v1822_v20 = vpop.eup %1821  ;;  %v561_v22 = vpop.f32.mrb[43].mxu0  ;;  %v1504_v24 = vpack.c.bf16 %v1820_v14, %v1812_v3  ;;  %v844_v30 = vadd.f32 %v843_v18, %v2465_v32  ;;  %1847 = vtanh.f32 %v842_v16 }
 0x210   : > { %v845_v23 = vpop.f32.mrb[43].mxu1  ;;  %v1824_v28 = vpop.eup %1823  ;;  %v1566_v35 = vpack.c.bf16 %v1822_v20, %v1814_v5  ;;  %v562_v37 = vadd.f32 %v561_v22, %v2468_v33  ;;  %1849 = vtanh.f32 %v560_v21 }
 0x211   : > { %v1826_v36 = vpop.eup %1825  ;;  %v1502_v38 = vpack.c.bf16 %v1824_v28, %v1816_v6  ;;  %v846_v40 = vadd.f32 %v845_v23, %v2471_v34  ;;  %1851 = vtanh.f32 %v844_v30  ;;  %v565_v43 = vpop.f32.mrb[44].mxu0 }
 0x212   : > { %v1828_v39 = vpop.eup %1827  ;;  %1567 = vmatprep.subr.bf16.mxu0 %v1566_v35  ;;  %v849_v44 = vpop.f32.mrb[44].mxu1  ;;  %1853 = vtanh.f32 %v562_v37  ;;  %v566_v46 = vadd.f32 %v565_v43, %v2462_v31 }
 0x213   : > { %v1830_v41 = vpop.eup %1829  ;;  %1503 = vmatprep.subr.bf16.mxu1 %v1502_v38  ;;  %1569 = vmatpush1.bf16.xpose.msra.mxu0 %v1568_v19  ;;  %v850_v47 = vadd.f32 %v849_v44, %v2465_v32  ;;  %v567_v48 = vpop.f32.mrb[45].mxu0  ;;  %1855 = vtanh.f32 %v846_v40 }
 0x214   : > { %v1832_v42 = vpop.eup %1831  ;;  %1505 = vmatpush1.bf16.xpose.msra.mxu1 %v1504_v24  ;;  %v851_v49 = vpop.f32.mrb[45].mxu1  ;;  %v568_v51 = vadd.f32 %v567_v48, %v2468_v33  ;;  %1857 = vtanh.f32 %v566_v46 }
 0x215   : > { %v1834_v45 = vpop.eup %1833  ;;  %v852_v52 = vadd.f32 %v851_v49, %v2471_v34  ;;  %v569_v53 = vpop.f32.mrb[46].mxu0  ;;  %1859 = vtanh.f32 %v850_v47 }
 0x216   : > { %v1836_v50 = vpop.eup %1835  ;;  %v853_v29 = vpop.f32.mrb[46].mxu1  ;;  %v1572_v54 = vpack.c.bf16 %v1834_v45, %v1826_v36  ;;  %v570_v56 = vadd.f32 %v569_v53, %v2462_v31  ;;  %1861 = vtanh.f32 %v568_v51 }
 0x217   : > { %v1838_v55 = vpop.eup %1837  ;;  %v571_v57 = vpop.f32.mrb[47].mxu0  ;;  %v1508_v59 = vpack.c.bf16 %v1836_v50, %v1828_v39  ;;  %v854_v61 = vadd.f32 %v853_v29, %v2465_v32  ;;  %1863 = vtanh.f32 %v852_v52 }
 0x218   : > { %v855_v58 = vpop.f32.mrb[47].mxu1  ;;  %v1840_v60 = vpop.eup %1839  ;;  %v1570_v62 = vpack.c.bf16 %v1838_v55, %v1830_v41  ;;  %v572_v0 = vadd.f32 %v571_v57, %v2468_v33  ;;  %1865 = vtanh.f32 %v570_v56 }
 0x219   : > { %v1842_v63 = vpop.eup %1841  ;;  %v1506_v1 = vpack.c.bf16 %v1840_v60, %v1832_v42  ;;  %v856_v3 = vadd.f32 %v855_v58, %v2471_v34  ;;  %1867 = vtanh.f32 %v854_v61  ;;  %v575_v6 = vpop.f32.mrb[48].mxu0 }
 0x21a   : > { %v1844_v2 = vpop.eup %1843  ;;  %1571 = vmatprep.subr.bf16.mxu0 %v1570_v62  ;;  %v859_v7 = vpop.f32.mrb[48].mxu1  ;;  %1869 = vtanh.f32 %v572_v0  ;;  %v576_v9 = vadd.f32 %v575_v6, %v2462_v31 }
 0x21b   : > { %v1846_v4 = vpop.eup %1845  ;;  %1507 = vmatprep.subr.bf16.mxu1 %v1506_v1  ;;  %1573 = vmatpush1.bf16.xpose.msra.mxu0 %v1572_v54  ;;  %v860_v10 = vadd.f32 %v859_v7, %v2465_v32  ;;  %v577_v11 = vpop.f32.mrb[49].mxu0  ;;  %1871 = vtanh.f32 %v856_v3 }
 0x21c   : > { %v1848_v5 = vpop.eup %1847  ;;  %1509 = vmatpush1.bf16.xpose.msra.mxu1 %v1508_v59  ;;  %v861_v12 = vpop.f32.mrb[49].mxu1  ;;  %v578_v14 = vadd.f32 %v577_v11, %v2468_v33  ;;  %1873 = vtanh.f32 %v576_v9 }
 0x21d   : > { %v1850_v8 = vpop.eup %1849  ;;  %v862_v15 = vadd.f32 %v861_v12, %v2471_v34  ;;  %v579_v16 = vpop.f32.mrb[50].mxu0  ;;  %1875 = vtanh.f32 %v860_v10 }
 0x21e   : > { %v1852_v13 = vpop.eup %1851  ;;  %v863_v17 = vpop.f32.mrb[50].mxu1  ;;  %v1576_v18 = vpack.c.bf16 %v1850_v8, %v1842_v63  ;;  %v580_v20 = vadd.f32 %v579_v16, %v2462_v31  ;;  %1877 = vtanh.f32 %v578_v14 }
 0x21f   : > { %v1854_v19 = vpop.eup %1853  ;;  %v581_v21 = vpop.f32.mrb[51].mxu0  ;;  %v1512_v23 = vpack.c.bf16 %v1852_v13, %v1844_v2  ;;  %v864_v28 = vadd.f32 %v863_v17, %v2465_v32  ;;  %1879 = vtanh.f32 %v862_v15 }
 0x220   : > { %v865_v22 = vpop.f32.mrb[51].mxu1  ;;  %v1856_v24 = vpop.eup %1855  ;;  %v1574_v30 = vpack.c.bf16 %v1854_v19, %v1846_v4  ;;  %v582_v36 = vadd.f32 %v581_v21, %v2468_v33  ;;  %1881 = vtanh.f32 %v580_v20 }
 0x221   : > { %v1858_v35 = vpop.eup %1857  ;;  %v1510_v37 = vpack.c.bf16 %v1856_v24, %v1848_v5  ;;  %v866_v39 = vadd.f32 %v865_v22, %v2471_v34  ;;  %1883 = vtanh.f32 %v864_v28  ;;  %v585_v42 = vpop.f32.mrb[52].mxu0 }
 0x222   : > { %v1860_v38 = vpop.eup %1859  ;;  %1575 = vmatprep.subr.bf16.mxu0 %v1574_v30  ;;  %v869_v43 = vpop.f32.mrb[52].mxu1  ;;  %1885 = vtanh.f32 %v582_v36  ;;  %v586_v45 = vadd.f32 %v585_v42, %v2462_v31 }
 0x223   : > { %v1862_v40 = vpop.eup %1861  ;;  %1511 = vmatprep.subr.bf16.mxu1 %v1510_v37  ;;  %1577 = vmatpush1.bf16.xpose.msra.mxu0 %v1576_v18  ;;  %v870_v46 = vadd.f32 %v869_v43, %v2465_v32  ;;  %v587_v47 = vpop.f32.mrb[53].mxu0  ;;  %1887 = vtanh.f32 %v866_v39 }
 0x224   : > { %v1864_v41 = vpop.eup %1863  ;;  %1513 = vmatpush1.bf16.xpose.msra.mxu1 %v1512_v23  ;;  %v871_v48 = vpop.f32.mrb[53].mxu1  ;;  %v588_v50 = vadd.f32 %v587_v47, %v2468_v33  ;;  %1889 = vtanh.f32 %v586_v45 }
 0x225   : > { %v1866_v44 = vpop.eup %1865  ;;  %v872_v51 = vadd.f32 %v871_v48, %v2471_v34  ;;  %v589_v52 = vpop.f32.mrb[54].mxu0  ;;  %1891 = vtanh.f32 %v870_v46 }
 0x226   : > { %v1868_v49 = vpop.eup %1867  ;;  %v873_v53 = vpop.f32.mrb[54].mxu1  ;;  %v1580_v29 = vpack.c.bf16 %v1866_v44, %v1858_v35  ;;  %v590_v55 = vadd.f32 %v589_v52, %v2462_v31  ;;  %1893 = vtanh.f32 %v588_v50 }
 0x227   : > { %v1870_v54 = vpop.eup %1869  ;;  %v591_v56 = vpop.f32.mrb[55].mxu0  ;;  %v1516_v58 = vpack.c.bf16 %v1868_v49, %v1860_v38  ;;  %v874_v60 = vadd.f32 %v873_v53, %v2465_v32  ;;  %1895 = vtanh.f32 %v872_v51 }
 0x228   : > { %v875_v57 = vpop.f32.mrb[55].mxu1  ;;  %v1872_v59 = vpop.eup %1871  ;;  %v1578_v61 = vpack.c.bf16 %v1870_v54, %v1862_v40  ;;  %v592_v63 = vadd.f32 %v591_v56, %v2468_v33  ;;  %1897 = vtanh.f32 %v590_v55 }
 0x229   : > { %v1874_v62 = vpop.eup %1873  ;;  %v1514_v0 = vpack.c.bf16 %v1872_v59, %v1864_v41  ;;  %v876_v2 = vadd.f32 %v875_v57, %v2471_v34  ;;  %1899 = vtanh.f32 %v874_v60  ;;  %v595_v5 = vpop.f32.mrb[56].mxu0 }
 0x22a   : > { %v1876_v1 = vpop.eup %1875  ;;  %1579 = vmatprep.subr.bf16.mxu0 %v1578_v61  ;;  %v879_v6 = vpop.f32.mrb[56].mxu1  ;;  %1901 = vtanh.f32 %v592_v63  ;;  %v596_v8 = vadd.f32 %v595_v5, %v2462_v31 }
 0x22b   : > { %v1878_v3 = vpop.eup %1877  ;;  %1515 = vmatprep.subr.bf16.mxu1 %v1514_v0  ;;  %1581 = vmatpush1.bf16.xpose.msra.mxu0 %v1580_v29  ;;  %v880_v9 = vadd.f32 %v879_v6, %v2465_v32  ;;  %v597_v10 = vpop.f32.mrb[57].mxu0  ;;  %1903 = vtanh.f32 %v876_v2 }
 0x22c   : > { %v1880_v4 = vpop.eup %1879  ;;  %1517 = vmatpush1.bf16.xpose.msra.mxu1 %v1516_v58  ;;  %v881_v11 = vpop.f32.mrb[57].mxu1  ;;  %v598_v13 = vadd.f32 %v597_v10, %v2468_v33  ;;  %1905 = vtanh.f32 %v596_v8 }
 0x22d   : > { %v1882_v7 = vpop.eup %1881  ;;  %v882_v14 = vadd.f32 %v881_v11, %v2471_v34  ;;  %v599_v15 = vpop.f32.mrb[58].mxu0  ;;  %1907 = vtanh.f32 %v880_v9 }
 0x22e   : > { %v1884_v12 = vpop.eup %1883  ;;  %v883_v16 = vpop.f32.mrb[58].mxu1  ;;  %v1584_v17 = vpack.c.bf16 %v1882_v7, %v1874_v62  ;;  %v600_v19 = vadd.f32 %v599_v15, %v2462_v31  ;;  %1909 = vtanh.f32 %v598_v13 }
 0x22f   : > { %v1886_v18 = vpop.eup %1885  ;;  %v601_v20 = vpop.f32.mrb[59].mxu0  ;;  %v1520_v22 = vpack.c.bf16 %v1884_v12, %v1876_v1  ;;  %v884_v24 = vadd.f32 %v883_v16, %v2465_v32  ;;  %1911 = vtanh.f32 %v882_v14 }
 0x230   : > { %v885_v21 = vpop.f32.mrb[59].mxu1  ;;  %v1888_v23 = vpop.eup %1887  ;;  %v1582_v28 = vpack.c.bf16 %v1886_v18, %v1878_v3  ;;  %v602_v35 = vadd.f32 %v601_v20, %v2468_v33  ;;  %1913 = vtanh.f32 %v600_v19  ;;  %v1943_v20 = vld [vmem:[%s2707_s3] sm:$0x3] }
 0x231   : > { %v1890_v30 = vpop.eup %1889  ;;  %v1518_v36 = vpack.c.bf16 %v1888_v23, %v1880_v4  ;;  %v886_v38 = vadd.f32 %v885_v21, %v2471_v34  ;;  %1915 = vtanh.f32 %v884_v24  ;;  %v605_v41 = vpop.f32.mrb[60].mxu0  ;;  %v1050_v21 = vrot.slane %v1943_v20, %v2454_v27 }
 0x232   : > { %v1892_v37 = vpop.eup %1891  ;;  %1583 = vmatprep.subr.bf16.mxu0 %v1582_v28  ;;  %v889_v42 = vpop.f32.mrb[60].mxu1  ;;  %1917 = vtanh.f32 %v602_v35  ;;  %v606_v44 = vadd.f32 %v605_v41, %v2462_v31  ;;  %v1945_v41 = vld [vmem:[%s2367_s27] sm:$0xff]  ;;  %s2629_s27 = scalar_lea.hbm %s2708_s4, %s1469_s0 }
 0x233   : > { %v1894_v39 = vpop.eup %1893  ;;  %1519 = vmatprep.subr.bf16.mxu1 %v1518_v36  ;;  %1585 = vmatpush1.bf16.xpose.msra.mxu0 %v1584_v17  ;;  %v890_v45 = vadd.f32 %v889_v42, %v2465_v32  ;;  %v607_v46 = vpop.f32.mrb[61].mxu0  ;;  %1919 = vtanh.f32 %v886_v38  ;;  %v1172_v42 = vunpack.c.h.bf16 %v1945_v41 }
 0x234   : > { %v1896_v40 = vpop.eup %1895  ;;  %1521 = vmatpush1.bf16.xpose.msra.mxu1 %v1520_v22  ;;  %v891_v47 = vpop.f32.mrb[61].mxu1  ;;  %v608_v49 = vadd.f32 %v607_v46, %v2468_v33  ;;  %1921 = vtanh.f32 %v606_v44  ;;  %v1944_v22 = vld [vmem:[%s2707_s3 + $0x2] sm:$0x3] }
 0x235   : > { %v1898_v43 = vpop.eup %1897  ;;  %v892_v50 = vadd.f32 %v891_v47, %v2471_v34  ;;  %v609_v51 = vpop.f32.mrb[62].mxu0  ;;  %1923 = vtanh.f32 %v890_v45  ;;  %v968_v23 = vrot.slane %v1944_v22, %v2454_v27 }
 0x236   : > { %v1900_v48 = vpop.eup %1899  ;;  %v893_v52 = vpop.f32.mrb[62].mxu1  ;;  %v1588_v53 = vpack.c.bf16 %v1898_v43, %v1890_v30  ;;  %v610_v54 = vadd.f32 %v609_v51, %v2462_v31  ;;  %1925 = vtanh.f32 %v608_v49  ;;  %v1171_v43 = vunpack.c.l.bf16 %v1945_v41 }
 0x237   : > { %v1902_v29 = vpop.eup %1901  ;;  %v611_v55 = vpop.f32.mrb[63].mxu0  ;;  %v1524_v57 = vpack.c.bf16 %v1900_v48, %v1892_v37  ;;  %v894_v59 = vadd.f32 %v893_v52, %v2465_v32  ;;  %1927 = vtanh.f32 %v892_v50 }
 0x238   : > { %v895_v56 = vpop.f32.mrb[63].mxu1  ;;  %v1904_v58 = vpop.eup %1903  ;;  %v1586_v60 = vpack.c.bf16 %v1902_v29, %v1894_v39  ;;  %v612_v62 = vadd.f32 %v611_v55, %v2468_v33  ;;  %1929 = vtanh.f32 %v610_v54  ;;  %v2150_v29 = vmov 1966171168  }
 0x239   : > { %v1906_v61 = vpop.eup %1905  ;;  %v1522_v63 = vpack.c.bf16 %v1904_v58, %v1896_v40  ;;  %v896_v1 = vadd.f32 %v895_v56, %v2471_v34  ;;  %1931 = vtanh.f32 %v894_v59  ;;  %v1152_v54 = vunpack.c.l.s4 %v2150_v29 }
 0x23a   : > { %v1908_v0 = vpop.eup %1907  ;;  %1587 = vmatprep.subr.bf16.mxu0 %v1586_v60  ;;  %1933 = vtanh.f32 %v612_v62 }
 0x23b   : > { %v1910_v2 = vpop.eup %1909  ;;  %1523 = vmatprep.subr.bf16.mxu1 %v1522_v63  ;;  %1589 = vmatpush1.bf16.xpose.msra.mxu0 %v1588_v53  ;;  %1935 = vtanh.f32 %v896_v1  ;;  %v1153_v55 = vunpack.c.0.s8 %v1152_v54 }
 0x23c   : > { %v1912_v31 = vpop.eup %1911  ;;  %1525 = vmatpush1.bf16.xpose.msra.mxu1 %v1524_v57 }
 0x23d   : > { %v1914_v3 = vpop.eup %1913  ;;  %v1156_v59 = vsub.s32 %v1153_v55, %v2451_v26 }
 0x23e   : > { %v1916_v32 = vpop.eup %1915  ;;  %v1592_v4 = vpack.c.bf16 %v1914_v3, %v1906_v61 }
 0x23f   : > { %v1918_v5 = vpop.eup %1917  ;;  %v1528_v33 = vpack.c.bf16 %v1916_v32, %v1908_v0 }
 0x240   : > { %v1920_v6 = vpop.eup %1919  ;;  %v1590_v7 = vpack.c.bf16 %v1918_v5, %v1910_v2 }
 0x241   : > { %v1922_v8 = vpop.eup %1921  ;;  %v1526_v9 = vpack.c.bf16 %v1920_v6, %v1912_v31 }
 0x242   : > { %v1924_v34 = vpop.eup %1923  ;;  %1591 = vmatprep.subr.bf16.mxu0 %v1590_v7 }
 0x243   : > { %v1926_v10 = vpop.eup %1925  ;;  %1527 = vmatprep.subr.bf16.mxu1 %v1526_v9  ;;  %1593 = vmatpush1.bf16.xpose.msra.mxu0 %v1592_v4 }
 0x244   : > { %v1928_v11 = vpop.eup %1927  ;;  %1529 = vmatpush1.bf16.xpose.msra.mxu1 %v1528_v33 }
 0x245   : > { %v1930_v12 = vpop.eup %1929 }
 0x246   : > { %v1932_v13 = vpop.eup %1931  ;;  %v1596_v14 = vpack.c.bf16 %v1930_v12, %v1922_v8 }
 0x247   : > { %v1934_v15 = vpop.eup %1933  ;;  %v1532_v16 = vpack.c.bf16 %v1932_v13, %v1924_v34 }
 0x248   : > { %v1936_v17 = vpop.eup %1935  ;;  %v1594_v18 = vpack.c.bf16 %v1934_v15, %v1926_v10 }
 0x249   : > { %v1530_v19 = vpack.c.bf16 %v1936_v17, %v1928_v11 }
 0x24a   : > { %1595 = vmatprep.subr.bf16.mxu0 %v1594_v18 }
 0x24b   : > { %1531 = vmatprep.subr.bf16.mxu1 %v1530_v19  ;;  %1597 = vmatpush1.bf16.xpose.msra.mxu0 %v1596_v14 }
 0x24c   : > { %1533 = vmatpush1.bf16.xpose.msra.mxu1 %v1532_v16 }
 0x24d   : > { %1173 = vmatprep.subr.mxu1 %v1172_v42 }
 0x252   : > { %1122 = vmatmul.mubr.f32.vlgmr.msra.gmra.mrb[64].mxu0 %v1050_v21 }
 0x253   : > { %1040 = vmatmul.mubr.f32.vlgmr.msra.gmra.mrb[64].mxu1 %v968_v23 }
 0x254   : > { %1174 = vmatpush1.xpose.msra.mxu1 %v1171_v43 }
 0x325   : > { %v1123_v24 = vpop.f32.mrb[64].mxu0 }
 0x326   : > { %v1041_v28 = vpop.f32.mrb[64].mxu1  ;;  %v1125_v30 = vpop.f32.mrb[65].mxu0 }
 0x327   : > { %v1124_v35 = vadd.f32 %v1123_v24, %v1041_v28  ;;  %v1043_v36 = vpop.f32.mrb[65].mxu1 }
 0x328   : > { %v1126_v37 = vadd.f32 %v1125_v30, %v1043_v36 }
 0x329   : > { %v1129_v38 = vsel %vm1128_vm1, %v1124_v35, -inf }
 0x32a   : > { %v1130_v39 = vsel %vm1128_vm1, %v1126_v37, -inf }
 0x32b   : > { %v1131_v40 = vmax.f32 %v1129_v38, %v1130_v39 }
 0x32d   : > { %1132 = vmax.xlane.f32.xlu1 %v1131_v40 }
 0x3ba   : > { %v1133_v27 = vpop.xlane.xlu1 %1132 }
 0x3bb   : > { %v1134_v44 = vsub.f32 %v1124_v35, %v1133_v27  ;;  %v1135_v45 = vsub.f32 %v1126_v37, %v1133_v27 }
 0x3bd   : > { %v1136_v46 = vmul.f32 1.442695, %v1134_v44  ;;  %v1138_v47 = vmul.f32 1.442695, %v1135_v45 }
 0x3bf   : > { %1937 = vpow2.f32 %v1136_v46 }
 0x3c0   : > { %1939 = vpow2.f32 %v1138_v47 }
 0x3c9   : > { %v1938_v48 = vpop.eup %1937 }
 0x3ca   : > { %v1940_v49 = vpop.eup %1939  ;;  %v1140_v50 = vsel %vm1128_vm1, %v1938_v48, 0.0 }
 0x3cb   : > { %1237 = vmatprep.mubr.f32.mxu1 %v1940_v49  ;;  %v1141_v51 = vsel %vm1128_vm1, %v1940_v49, 0.0 }
 0x3cc   : > { %1238 = vmatmul.mubr.f32.vlgmr.msra.gmra.mrb[66].mxu1 %v1938_v48  ;;  %v1142_v52 = vadd.f32 %v1141_v51, %v1140_v50 }
 0x3ce   : > { %1143 = vadd.xlane.f32.xlu1 %v1142_v52 }
 0x45b   : > { %v1144_v53 = vpop.xlane.xlu1 %1143 }
 0x45c   : > { %1941 = vrcp.f32 %v1144_v53 }
 0x466   : > { %v1942_v56 = vpop.eup %1941 }
 0x467   : > { %v1146_v57 = vmul.f32 %v1942_v56, %v1938_v48  ;;  %v1147_v58 = vmul.f32 %v1942_v56, %v1940_v49 }
 0x469   : > { %v1150_v60 = vcombine.low %v1146_v57, %v1147_v58 }
 0x46b   : > { %v1157_v61 = vrot.slane %v1150_v60, %v1156_v59 }
 0x46d   : > { %v1164_v62 = vrot.slane %v1157_v61, %v1156_v59 }
 0x46f   : > { %1170 = vst.msk [vmem:[%s296_s25] sm:$0x3] %vm1168_vm2, %v1164_v62 }
 0x470   : > { %2047 = shalt.err (!%p2044_p7)
}
 0x471   : > { %s2048_s30 = scalar_lea.hbm %s2629_s27, 32  ;;  %s2052_s16 = scalar_lea.hbm %s2708_s4, 64 }
 0x472   : > { %p2049_p9 = scmp.ne.s32.totalorder %s2629_s27, %s2048_s30  ;;  %p2053_p3 = scmp.lt.u32.totalorder %s2629_s27, %s2708_s4 }
 0x473   : > { %p2054_p10 = scmp.lt.u32.totalorder %s2052_s16, %s2048_s30  ;;  %p2056_p2 = scmp.lt.u32.totalorder %s2048_s30, %s2629_s27 }
 0x474   : > { %p2050_p12 = pnand %p2049_p9, %p2733_p5 }
 0x475   : > { %p2055_p1 = por %p2054_p10, %p2053_p3 }
 0x476   : > { %p2051_p6 = pneg %p2050_p12 }
 0x477   : > { %p2057_p0 = por %p2056_p2, %p2055_p1 }
 0x479   : > { %p2058_p11 = pnand %p2057_p0, %p2051_p6 }
 0x47b   : > { %2061 = shalt.err (!%p2058_p11)
}
 0x47c   : > { %1608 = dma.vmem_to_hbm [thread:$0]  (%p2733_p5), %s2631_s17, 32, %s2629_s27, %s1247_s10   ;;  %vm1244_vm3 = vcmask 24576  }
 0x47d   : > { %s1464_s0 = sshll.u32 %s2265_s6, 4  ;;  %s302_s25 = scalar_lea.vmem [#allocation9], %s2364_s29 }
 0x47e   : > { %s1278_s8 = sshll.u32 %s302_s25, 4  ;;  %s2660_s12 = scalar_lea.hbm %s2709_s5, %s1464_s0  ;;  %s2662_s8 = int_to_ptr.vmem [resolvable:$true] %s1278_s8 }
 0x47f   : > { %s1252_s13 = scalar_lea.sflag [#allocation10], %s2364_s29  ;;  %s2062_s17 = scalar_lea.vmem %s2662_s8, 16 }
 0x480   : > { %p2063_p13 = scmp.ne.s32.totalorder %s2662_s8, %s2062_s17  ;;  %s2152_s6 = smov [#allocation9]  }
 0x481   : > { %s2066_s27 = sshll.u32 %s2152_s6, 4  ;;  %s2067_s27 = int_to_ptr.vmem [resolvable:$false] %s2066_s27 }
 0x482   : > { %p2064_p8 = pnand %p2063_p13, %p2733_p5  ;;  %s2068_s10 = scalar_lea.vmem %s2067_s27, 32 }
 0x483   : > { %p2069_p7 = scmp.lt.s32.totalorder %s2662_s8, %s2067_s27  ;;  %p2070_p9 = scmp.lt.s32.totalorder %s2068_s10, %s2062_s17 }
 0x484   : > { %p2065_p4 = pneg %p2064_p8 }
 0x485   : > { %p2071_p12 = por %p2070_p9, %p2069_p7 }
 0x487   : > { %p2072_p6 = pnand %p2071_p12, %p2065_p4 }
 0x49f   : > { %v1239_v25 = vpop.f32.mrb[66].mxu1 }
 0x4a0   : > { %v1243_v26 = vmul.f32 %v1942_v56, %v1239_v25  ;;  %v1241_v63 = vpop.f32.mrb[67].mxu1 }
 0x4a2   : > { %1245 = vst.msk [vmem:[%s302_s25] sm:$0x1] %vm1244_vm3, %v1243_v26 }
 0x4a3   : > { %2075 = shalt.err (!%p2072_p6)
}
 0x4a4   : > { %s2076_s29 = scalar_lea.hbm %s2660_s12, 16  ;;  %s2080_s24 = scalar_lea.hbm %s2709_s5, 32 }
 0x4a5   : > { %p2077_p3 = scmp.ne.s32.totalorder %s2660_s12, %s2076_s29  ;;  %p2081_p2 = scmp.lt.u32.totalorder %s2660_s12, %s2709_s5 }
 0x4a6   : > { %p2082_p0 = scmp.lt.u32.totalorder %s2080_s24, %s2076_s29  ;;  %p2084_p13 = scmp.lt.u32.totalorder %s2076_s29, %s2660_s12 }
 0x4a7   : > { %p2078_p10 = pnand %p2077_p3, %p2733_p5 }
 0x4a8   : > { %p2083_p11 = por %p2082_p0, %p2081_p2 }
 0x4a9   : > { %p2079_p1 = pneg %p2078_p10 }
 0x4aa   : > { %p2085_p8 = por %p2084_p13, %p2083_p11 }
 0x4ac   : > { %p2086_p4 = pnand %p2085_p8, %p2079_p1 }
 0x4ae   : > { %2089 = shalt.err (!%p2086_p4)
}
 0x4af   : > { %1609 = dma.vmem_to_hbm [thread:$0]  (%p2733_p5), %s2662_s8, 16, %s2660_s12, %s1252_s13  }
 0x4b0 PF: > { %s1290_s15 = sand.u32 1, %s2128_s18   ;;  %p2734_p7 = scmp.ne.s32.totalorder %s2723_s9, 0 }
 0x4b1   : > { %p2735_p9 = scmp.ge.s32.totalorder %s2140_s21, 2  ;;  %s1291_s23 = scalar_lea.sflag [#allocation4], %s1290_s15 }
 0x4b3   : > { %p1624_p12 = pnand %p2735_p9, %p2734_p7 }
 0x4b5   : > { %2119 = dma.done.wait (!%p1624_p12), %s1291_s23, 32  }
 0x4b6   : > { %2121 = vsyncadd (!%p1624_p12), %s1291_s23, 4294967264  ;;  %s1300_s0 = scalar_lea.sflag [#allocation10], %s1290_s15 }
 0x4b7   : > { %2123 = dma.done.wait (!%p1624_p12), %s1300_s0, 16  }
 0x4b8   : > { %2125 = vsyncadd (!%p1624_p12), %s1300_s0, 4294967280  ;;  %s2736_s7 = sld [smem:[#allocation16_spill]]  ;;  %p23_p5 = scmp.ge.s32.totalorder %s2204_s22, 4  }
 0x4b9   : > { %s2737_s18 = smov %s2132_s19  ;;  %s2738_s19 = smov %s2136_s20 }
 0x4ba   : > { %s2740_s21 = smov %s2204_s22  ;;  %25 = sbr.rel (!%p23_p5) target bundleno = 10 (0xa), region = 116 }
 0x4be   : > { %s2739_s20 = smov %s2736_s7 }
 0x4c1   :  { %1304 = vsyncpa [#allocation3], 1 }
 0x4c2   :  { %1306 = vsyncpa [#allocation3 + $0x1], 1 }
 0x4c3   :  { %1307 = vsyncpa [#allocation6], 1 }
 0x4c4   :  { %1308 = vsyncpa [#allocation4], 1 }
 0x4c5   :  { %1310 = vsyncpa [#allocation4 + $0x1], 1 }
 0x4c6   :  { %1311 = vsyncpa [#allocation10], 1 }
 0x4c7   :  { %1313 = vsyncpa [#allocation10 + $0x1], 1 }

</bundles_post_ra>
